<compile_context>
chip_gen: v7x
topology: tpu7x:2x2x1
jax: 0.10.0
libtpu: 0.0.40
codegen_flags: <defaults>
</compile_context>

<pallas_src>
import math
import functools

import jax
import jax.numpy as jnp
from jax import lax
from jax.experimental import pallas as pl
from jax.experimental.pallas import tpu as pltpu


# ------------------------------ small helpers ---------------------------------

def _round_up(x, m):
    return (x + m - 1) // m * m


def _pick_row_tile(n, candidates=(1024, 512, 256, 128)):
    for c in candidates:
        if n >= c and n % c == 0:
            return c
    return n


def _pick_seq_tile(t, candidates=(128, 64)):
    for c in candidates:
        if t >= c and t % c == 0:
            return c
    return t


def _vmem_limit_bytes():
    # Generation-aware VMEM budget: ~80% of physical (v5e/v6e ~102 MiB, v7x ~51 MiB).
    try:
        cap = pltpu.get_tpu_info().vmem_capacity_bytes
    except Exception:
        cap = 64 * 1024 * 1024
    return min(int(cap * 0.8), 110 * 1024 * 1024)


def _layer_norm(h, g, b, eps=1e-5):
    # h: (rows, C) f32; g, b: (1, C) f32 -- stats in f32
    mu = jnp.mean(h, axis=-1, keepdims=True)
    var = jnp.mean((h - mu) ** 2, axis=-1, keepdims=True)
    return (h - mu) * lax.rsqrt(var + eps) * g + b


def _gelu_tanh(x):
    # matches nn.GELU(approximate='tanh')
    c = math.sqrt(2.0 / math.pi)
    return 0.5 * x * (1.0 + jnp.tanh(c * (x + 0.044715 * x * x * x)))


# ------------------------------ Pallas kernels --------------------------------

def gpt_block_kernel(x_ref, ln1_g_ref, ln1_b_ref,
                     w_q_ref, b_q_ref, w_kv_ref, b_kv_ref,
                     w_ap_ref, b_ap_ref,
                     ln2_g_ref, ln2_b_ref,
                     w_fc_ref, b_fc_ref, w_pj_ref, b_pj_ref,
                     out_ref, k_scr, v_scr, *, n_head, tq):
    """All transformer layers for one batch element.

    grid = (B, L): batch outer ("parallel"), layer inner ("arbitrary").
    The residual stream lives in the revisited output block (VMEM-resident
    across the layer axis); per-layer weights are streamed/pipelined.
    """
    layer = pl.program_id(1)

    @pl.when(layer == 0)
    def _():
        out_ref[...] = x_ref[...]          # seed the resident residual stream

    _, T, C = out_ref.shape
    hd = C // n_head
    n_chunks = T // tq
    scale = 1.0 / math.sqrt(hd)

    # ---- pass 1: K/V for the full sequence (chunked; stored bf16, head-major) ----
    def kv_body(i, carry):
        s0 = pl.multiple_of(i * tq, tq)
        res = out_ref[0, pl.ds(s0, tq), :]                              # (tq, C) f32
        x1 = _layer_norm(res, ln1_g_ref[0], ln1_b_ref[0]).astype(jnp.bfloat16)
        kv = jnp.dot(x1, w_kv_ref[0],
                     preferred_element_type=jnp.float32) + b_kv_ref[0]  # (tq, 2C) f32
        k = jnp.transpose(kv[:, :C].reshape(tq, n_head, hd), (1, 0, 2))
        v = jnp.transpose(kv[:, C:].reshape(tq, n_head, hd), (1, 0, 2))
        k_scr[:, pl.ds(s0, tq), :] = k.astype(jnp.bfloat16)
        v_scr[:, pl.ds(s0, tq), :] = v.astype(jnp.bfloat16)
        return carry

    lax.fori_loop(0, n_chunks, kv_body, 0)

    # ---- pass 2: per q-chunk attention + out-proj + MLP (flash-style tiling) ----
    # TODO(synk): skip k-tiles fully above the causal diagonal (online-softmax
    #             k-tile loop) to cut attention MXU work ~2x at large T.
    def chunk_body(i, carry):
        s0 = pl.multiple_of(i * tq, tq)
        res = out_ref[0, pl.ds(s0, tq), :]                              # (tq, C) f32
        x1 = _layer_norm(res, ln1_g_ref[0], ln1_b_ref[0])
        q = jnp.dot(x1.astype(jnp.bfloat16), w_q_ref[0],
                    preferred_element_type=jnp.float32) + b_q_ref[0]    # (tq, C) f32
        # fold 1/sqrt(hd) into the (small) Q tile, not the (H,tq,T) scores
        q = jnp.transpose((q * scale).reshape(tq, n_head, hd),
                          (1, 0, 2)).astype(jnp.bfloat16)               # (H, tq, hd)

        s = jnp.einsum('hqd,hkd->hqk', q, k_scr[...],
                       preferred_element_type=jnp.float32)              # (H, tq, T) f32
        rows = s0 + lax.broadcasted_iota(jnp.int32, (tq, T), 0)
        cols = lax.broadcasted_iota(jnp.int32, (tq, T), 1)
        s = jnp.where((rows >= cols)[None, :, :], s, -1e30)
        s = s - jnp.max(s, axis=-1, keepdims=True)
        p = jnp.exp(s)
        inv = pl.reciprocal(jnp.sum(p, axis=-1, keepdims=True), approx=True)
        p = (p * inv).astype(jnp.bfloat16)

        y = jnp.einsum('hqk,hkd->hqd', p, v_scr[...],
                       preferred_element_type=jnp.float32)              # (H, tq, hd)
        # TODO(synk): fold the head merge into c_proj (einsum 'hqd,hdc->qc') once
        #             multi-axis-contraction dot lowering is confirmed on Mosaic.
        y = jnp.transpose(y, (1, 0, 2)).reshape(tq, C)
        att = jnp.dot(y.astype(jnp.bfloat16), w_ap_ref[0],
                      preferred_element_type=jnp.float32) + b_ap_ref[0]

        r1 = res + att
        x2 = _layer_norm(r1, ln2_g_ref[0], ln2_b_ref[0])
        h = jnp.dot(x2.astype(jnp.bfloat16), w_fc_ref[0],
                    preferred_element_type=jnp.float32) + b_fc_ref[0]   # (tq, 4C) f32
        h = _gelu_tanh(h)
        h = jnp.dot(h.astype(jnp.bfloat16), w_pj_ref[0],
                    preferred_element_type=jnp.float32) + b_pj_ref[0]   # (tq, C) f32
        out_ref[0, pl.ds(s0, tq), :] = r1 + h
        return carry

    lax.fori_loop(0, n_chunks, chunk_body, 0)


def lnf_kernel(x_ref, g_ref, b_ref, o_ref):
    """Final LayerNorm, hoisted out of the vocab loop; emits bf16 activations."""
    o_ref[...] = _layer_norm(x_ref[...], g_ref[...], b_ref[...]).astype(o_ref.dtype)


def lm_head_kernel(xn_ref, w_ref, o_ref):
    """One vocab tile of the weight-tied lm_head (pure matmul)."""
    o_ref[...] = jnp.dot(xn_ref[...], w_ref[...],
                         preferred_element_type=jnp.float32).astype(o_ref.dtype)


# ------------------------------ wrappers ---------------------------------------

def _blocks_forward(x, p, n_head):
    B, T, C = x.shape
    L = p['w_q'].shape[0]
    hd = C // n_head
    tq = _pick_seq_tile(T)

    args = (x, p['ln1_g'], p['ln1_b'], p['w_q'], p['b_q'], p['w_kv'], p['b_kv'],
            p['w_aproj'], p['b_aproj'], p['ln2_g'], p['ln2_b'],
            p['w_fc'], p['b_fc'], p['w_proj'], p['b_proj'])

    in_specs = [pl.BlockSpec((1, T, C), lambda b, l: (b, 0, 0))]
    # all per-layer params stacked as (L, d1, d2); streamed per layer step
    in_specs += [pl.BlockSpec((1,) + a.shape[1:], lambda b, l: (l, 0, 0))
                 for a in args[1:]]

    return pl.pallas_call(
        functools.partial(gpt_block_kernel, n_head=n_head, tq=tq),
        out_shape=jax.ShapeDtypeStruct((B, T, C), jnp.float32),
        grid=(B, L),
        in_specs=in_specs,
        out_specs=pl.BlockSpec((1, T, C), lambda b, l: (b, 0, 0)),
        scratch_shapes=[pltpu.VMEM((n_head, T, hd), jnp.bfloat16),   # K (head-major)
                        pltpu.VMEM((n_head, T, hd), jnp.bfloat16)],  # V (head-major)
        input_output_aliases={0: 0},   # residual stream updated in place
        compiler_params=pltpu.CompilerParams(
            dimension_semantics=("parallel", "arbitrary"),
            vmem_limit_bytes=_vmem_limit_bytes()),
    )(*args)


def _head_forward(x, lnf_g, lnf_b, w_head, *, tile_v=512, logits_dtype=jnp.float32):
    B, T, C = x.shape
    V = w_head.shape[1]
    M = B * T
    x2d = x.reshape(M, C)
    tm = _pick_row_tile(M)
    n_m = M // tm
    vmem = _vmem_limit_bytes()

    # ln_f once (bf16 output) -- not recomputed per vocab tile
    xn = pl.pallas_call(
        lnf_kernel,
        out_shape=jax.ShapeDtypeStruct((M, C), jnp.bfloat16),
        grid=(n_m,),
        in_specs=[pl.BlockSpec((tm, C), lambda i: (i, 0)),
                  pl.BlockSpec((1, C), lambda i: (0, 0)),
                  pl.BlockSpec((1, C), lambda i: (0, 0))],
        out_specs=pl.BlockSpec((tm, C), lambda i: (i, 0)),
        compiler_params=pltpu.CompilerParams(
            dimension_semantics=("parallel",), vmem_limit_bytes=vmem),
    )(x2d, lnf_g, lnf_b)

    tn = min(tile_v, _round_up(V, 128))
    n_v = (V + tn - 1) // tn
    v_pad = n_v * tn
    if v_pad != V:
        # pad the weight once (host-side op); output stays unpadded -> no logits slice copy
        w_head = jnp.pad(w_head, ((0, 0), (0, v_pad - V)))

    if M * C * 2 <= 16 * 1024 * 1024:
        # full bf16 activation slab resident in VMEM (single-buffered, constant index),
        # grid over vocab tiles only -> tied head weight streams from HBM exactly once
        grid = (n_v,)
        in_specs = [pl.BlockSpec((M, C), lambda v: (0, 0),
                                 pipeline_mode=pl.Buffered(1)),
                    pl.BlockSpec((C, tn), lambda v: (0, v))]
        out_specs = pl.BlockSpec((M, tn), lambda v: (0, v))
        dims = ("parallel",)
    else:
        # fallback for very large B*T: tile rows too (vocab outer so w_head streams once)
        grid = (n_v, n_m)
        in_specs = [pl.BlockSpec((tm, C), lambda v, m: (m, 0)),
                    pl.BlockSpec((C, tn), lambda v, m: (0, v))]
        out_specs = pl.BlockSpec((tm, tn), lambda v, m: (m, v))
        dims = ("parallel", "parallel")

    logits2d = pl.pallas_call(
        lm_head_kernel,
        out_shape=jax.ShapeDtypeStruct((M, V), logits_dtype),
        grid=grid,
        in_specs=in_specs,
        out_specs=out_specs,
        compiler_params=pltpu.CompilerParams(
            dimension_semantics=dims, vmem_limit_bytes=vmem),
    )(xn, w_head)
    return logits2d.reshape(B, T, V)


def gpt_forward(tokens, params, *, n_head, logits_dtype=jnp.float32):
    """GPT.forward(x) -> logits (loss path with targets y not implemented)."""
    B, T = tokens.shape
    # embedding lookups (glue, plain JAX)
    tok_embd = jnp.take(params['wte'], tokens, axis=0)           # (B, T, C) f32
    pos_embd = params['wpe'][:T]                                 # (T, C) f32
    x = (tok_embd + pos_embd[None, :, :]).astype(jnp.float32)
    x = _blocks_forward(x, params, n_head)
    # TODO(synk): fused cross-entropy (per-vocab-tile logsumexp + target gather)
    #             so full logits never hit HBM when targets are provided.
    return _head_forward(x, params['lnf_g'], params['lnf_b'], params['w_head'],
                         logits_dtype=logits_dtype)


# ------------------------------ parameter init ---------------------------------

def init_params(key, *, n_layer, n_head, n_embd, vocab_size, block_size):
    C = n_embd
    L = n_layer
    std = 0.02
    res_std = 0.02 * (2 * n_layer) ** (-0.5)
    ks = jax.random.split(key, 6)

    def normal(k, shape, s, dtype=jnp.float32):
        return (s * jax.random.normal(k, shape, dtype=jnp.float32)).astype(dtype)

    wte = normal(ks[0], (vocab_size, C), std)                    # f32 for gather
    wpe = normal(ks[1], (block_size, C), std)
    w_attn = normal(ks[2], (L, C, 3 * C), std, jnp.bfloat16)     # [q | k | v] columns

    return dict(
        wte=wte,
        wpe=wpe,
        ln1_g=jnp.ones((L, 1, C), jnp.float32),
        ln1_b=jnp.zeros((L, 1, C), jnp.float32),
        w_q=w_attn[:, :, :C],
        b_q=jnp.zeros((L, 1, C), jnp.float32),
        w_kv=w_attn[:, :, C:],
        b_kv=jnp.zeros((L, 1, 2 * C), jnp.float32),
        w_aproj=normal(ks[3], (L, C, C), res_std, jnp.bfloat16),
        b_aproj=jnp.zeros((L, 1, C), jnp.float32),
        ln2_g=jnp.ones((L, 1, C), jnp.float32),
        ln2_b=jnp.zeros((L, 1, C), jnp.float32),
        w_fc=normal(ks[4], (L, C, 4 * C), std, jnp.bfloat16),
        b_fc=jnp.zeros((L, 1, 4 * C), jnp.float32),
        w_proj=normal(ks[5], (L, 4 * C, C), res_std, jnp.bfloat16),
        b_proj=jnp.zeros((L, 1, C), jnp.float32),
        lnf_g=jnp.ones((1, C), jnp.float32),
        lnf_b=jnp.zeros((1, C), jnp.float32),
        w_head=wte.T.astype(jnp.bfloat16),   # weight tying: lm_head.weight = wte.weight
    )


# ------------------------------ main --------------------------------------------

if __name__ == "__main__":
    # small config consistent with GPTConfig semantics
    n_layer, n_head, n_embd = 2, 2, 32
    vocab_size, block_size = 256, 16
    B, T = 2, 8

    key = jax.random.PRNGKey(0)
    k_param, k_tok = jax.random.split(key)

    params = init_params(k_param, n_layer=n_layer, n_head=n_head,
                         n_embd=n_embd, vocab_size=vocab_size,
                         block_size=block_size)
    tokens = jax.random.randint(k_tok, (B, T), 0, vocab_size, dtype=jnp.int32)

    fwd = jax.jit(functools.partial(gpt_forward, n_head=n_head))
    logits = jax.block_until_ready(fwd(tokens, params))

    assert logits.shape == (B, T, vocab_size), logits.shape
    assert logits.dtype == jnp.float32
    assert bool(jnp.all(jnp.isfinite(logits)))
    print("KERNEL_OK")
</pallas_src>

<mosaic_0001>
module attributes {stable_mosaic.version = 11 : i64} {
  func.func @lm_head_kernel(%arg0: i32, %arg1: memref<16x32xbf16, #tpu.memory_space<vmem>>, %arg2: memref<32x256xbf16, #tpu.memory_space<vmem>>, %arg3: memref<16x256xf32, #tpu.memory_space<vmem>>) attributes {dimension_semantics = [#tpu.dimension_semantics<parallel>], iteration_bounds = array<i64: 1>, scalar_prefetch = 0 : i64, scratch_operands = 0 : i64, tpu.core_type = #tpu.core_type<tc>, window_params = [{pipeline_mode = #tpu.pipeline_mode<synchronous>, transform_indices = @transform_0, window_bounds = array<i64: 16, 32>}, {transform_indices = @transform_1, window_bounds = array<i64: 32, 256>}, {transform_indices = @transform_2, window_bounds = array<i64: 16, 256>}]} {
    %c0 = arith.constant 0 : index
    %c0_0 = arith.constant 0 : index
    %0 = vector.load %arg1[%c0, %c0_0] : memref<16x32xbf16, #tpu.memory_space<vmem>>, vector<16x32xbf16>
    %c0_1 = arith.constant 0 : index
    %c0_2 = arith.constant 0 : index
    %1 = vector.load %arg2[%c0_1, %c0_2] : memref<32x256xbf16, #tpu.memory_space<vmem>>, vector<32x256xbf16>
    %cst = arith.constant dense<0.000000e+00> : vector<16x256xf32>
    %2 = tpu.matmul %0, %1, %cst {dimension_numbers = #tpu.dot_dimension_numbers<[1], [0], [0], [1], [0, 0, 1, 1], [], []>} : vector<16x32xbf16>, vector<32x256xbf16>, vector<16x256xf32> -> vector<16x256xf32>
    %c0_3 = arith.constant 0 : index
    %c0_4 = arith.constant 0 : index
    %3 = vector.load %arg3[%c0_3, %c0_4] : memref<16x256xf32, #tpu.memory_space<vmem>>, vector<16x256xf32>
    tpu.vector_store %arg3[%c0_3, %c0_4], %2 {strides = array<i32>} : memref<16x256xf32, #tpu.memory_space<vmem>>, vector<16x256xf32>,
    return
  }
  func.func @transform_0(%arg0: i32) -> (i32, i32) {
    %c0_i32 = arith.constant 0 : i32
    %c0_i32_0 = arith.constant 0 : i32
    %c0_i32_1 = arith.constant 0 : i32
    return %c0_i32, %c0_i32_0 : i32, i32
  }
  func.func @transform_1(%arg0: i32) -> (i32, i32) {
    %c0_i32 = arith.constant 0 : i32
    %c0_i32_0 = arith.constant 0 : i32
    return %c0_i32, %arg0 : i32, i32
  }
  func.func @transform_2(%arg0: i32) -> (i32, i32) {
    %c0_i32 = arith.constant 0 : i32
    %c0_i32_0 = arith.constant 0 : i32
    return %c0_i32, %arg0 : i32, i32
  }
}

module attributes {stable_mosaic.version = 11 : i64} {
  func.func @gpt_block_kernel(%arg0: i32, %arg1: i32, %arg2: memref<1x8x32xf32, #tpu.memory_space<vmem>>, %arg3: memref<1x1x32xf32, #tpu.memory_space<vmem>>, %arg4: memref<1x1x32xf32, #tpu.memory_space<vmem>>, %arg5: memref<1x32x32xbf16, #tpu.memory_space<vmem>>, %arg6: memref<1x1x32xf32, #tpu.memory_space<vmem>>, %arg7: memref<1x32x64xbf16, #tpu.memory_space<vmem>>, %arg8: memref<1x1x64xf32, #tpu.memory_space<vmem>>, %arg9: memref<1x32x32xbf16, #tpu.memory_space<vmem>>, %arg10: memref<1x1x32xf32, #tpu.memory_space<vmem>>, %arg11: memref<1x1x32xf32, #tpu.memory_space<vmem>>, %arg12: memref<1x1x32xf32, #tpu.memory_space<vmem>>, %arg13: memref<1x32x128xbf16, #tpu.memory_space<vmem>>, %arg14: memref<1x1x128xf32, #tpu.memory_space<vmem>>, %arg15: memref<1x128x32xbf16, #tpu.memory_space<vmem>>, %arg16: memref<1x1x32xf32, #tpu.memory_space<vmem>>, %arg17: memref<1x8x32xf32, #tpu.memory_space<vmem>>, %arg18: memref<2x8x16xbf16, #tpu.memory_space<vmem>>, %arg19: memref<2x8x16xbf16, #tpu.memory_space<vmem>>) attributes {dimension_semantics = [#tpu.dimension_semantics<parallel>, #tpu.dimension_semantics<arbitrary>], iteration_bounds = array<i64: 2, 2>, scalar_prefetch = 0 : i64, scratch_operands = 2 : i64, tpu.core_type = #tpu.core_type<tc>, window_params = [{transform_indices = @transform_0, window_bounds = array<i64: 1, 8, 32>}, {transform_indices = @transform_1, window_bounds = array<i64: 1, 1, 32>}, {transform_indices = @transform_2, window_bounds = array<i64: 1, 1, 32>}, {transform_indices = @transform_3, window_bounds = array<i64: 1, 32, 32>}, {transform_indices = @transform_4, window_bounds = array<i64: 1, 1, 32>}, {transform_indices = @transform_5, window_bounds = array<i64: 1, 32, 64>}, {transform_indices = @transform_6, window_bounds = array<i64: 1, 1, 64>}, {transform_indices = @transform_7, window_bounds = array<i64: 1, 32, 32>}, {transform_indices = @transform_8, window_bounds = array<i64: 1, 1, 32>}, {transform_indices = @transform_9, window_bounds = array<i64: 1, 1, 32>}, {transform_indices = @transform_10, window_bounds = array<i64: 1, 1, 32>}, {transform_indices = @transform_11, window_bounds = array<i64: 1, 32, 128>}, {transform_indices = @transform_12, window_bounds = array<i64: 1, 1, 128>}, {transform_indices = @transform_13, window_bounds = array<i64: 1, 128, 32>}, {transform_indices = @transform_14, window_bounds = array<i64: 1, 1, 32>}, {transform_indices = @transform_15, window_bounds = array<i64: 1, 8, 32>}]} {
    %c0_i32 = arith.constant 0 : i32
    %0 = arith.cmpi eq, %arg1, %c0_i32 : i32
    %1 = arith.extui %0 : i1 to i32
    %c0_i32_0 = arith.constant 0 : i32
    %2 = arith.cmpi ne, %1, %c0_i32_0 : i32
    scf.if %2 {
      %c0_97 = arith.constant 0 : index
      %c0_98 = arith.constant 0 : index
      %c0_99 = arith.constant 0 : index
      %194 = vector.load %arg2[%c0_97, %c0_98, %c0_99] : memref<1x8x32xf32, #tpu.memory_space<vmem>>, vector<1x8x32xf32>
      %c0_100 = arith.constant 0 : index
      %c0_101 = arith.constant 0 : index
      %c0_102 = arith.constant 0 : index
      %195 = vector.load %arg17[%c0_100, %c0_101, %c0_102] : memref<1x8x32xf32, #tpu.memory_space<vmem>>, vector<1x8x32xf32>
      tpu.vector_store %arg17[%c0_100, %c0_101, %c0_102], %194 {strides = array<i32>} : memref<1x8x32xf32, #tpu.memory_space<vmem>>, vector<1x8x32xf32>,
    } else {
    }
    %c0_i32_1 = arith.constant 0 : i32
    %c8_i32 = arith.constant 8 : i32
    %3 = arith.muli %c0_i32_1, %c8_i32 : i32
    %4 = tpu.assume_multiple %3, 8 : i32
    %c0 = arith.constant 0 : index
    %5 = arith.index_cast %4 : i32 to index
    %c0_2 = arith.constant 0 : index
    %6 = vector.load %arg17[%c0, %5, %c0_2] : memref<1x8x32xf32, #tpu.memory_space<vmem>>, vector<1x8x32xf32>
    %7 = vector.shape_cast %6 : vector<1x8x32xf32> to vector<8x32xf32>
    %c0_3 = arith.constant 0 : index
    %c0_4 = arith.constant 0 : index
    %c0_5 = arith.constant 0 : index
    %8 = vector.load %arg3[%c0_3, %c0_4, %c0_5] : memref<1x1x32xf32, #tpu.memory_space<vmem>>, vector<1x1x32xf32>
    %9 = vector.shape_cast %8 : vector<1x1x32xf32> to vector<1x32xf32>
    %c0_6 = arith.constant 0 : index
    %c0_7 = arith.constant 0 : index
    %c0_8 = arith.constant 0 : index
    %10 = vector.load %arg4[%c0_6, %c0_7, %c0_8] : memref<1x1x32xf32, #tpu.memory_space<vmem>>, vector<1x1x32xf32>
    %11 = vector.shape_cast %10 : vector<1x1x32xf32> to vector<1x32xf32>
    %cst = arith.constant dense<0.000000e+00> : vector<8xf32>
    %12 = vector.multi_reduction <add>, %7, %cst [1] : vector<8x32xf32> to vector<8xf32>
    %13 = vector.shape_cast %12 : vector<8xf32> to vector<8x1xf32>
    %cst_9 = arith.constant 3.200000e+01 : f32
    %14 = vector.broadcast %cst_9 : f32 to vector<8x1xf32>
    %15 = arith.divf %13, %14 : vector<8x1xf32>
    %16 = vector.broadcast %15 : vector<8x1xf32> to vector<8x32xf32>
    %17 = arith.subf %7, %16 : vector<8x32xf32>
    %18 = arith.mulf %17, %17 : vector<8x32xf32>
    %cst_10 = arith.constant dense<0.000000e+00> : vector<8xf32>
    %19 = vector.multi_reduction <add>, %18, %cst_10 [1] : vector<8x32xf32> to vector<8xf32>
    %20 = vector.shape_cast %19 : vector<8xf32> to vector<8x1xf32>
    %cst_11 = arith.constant 3.200000e+01 : f32
    %21 = vector.broadcast %cst_11 : f32 to vector<8x1xf32>
    %22 = arith.divf %20, %21 : vector<8x1xf32>
    %23 = vector.broadcast %15 : vector<8x1xf32> to vector<8x32xf32>
    %24 = arith.subf %7, %23 : vector<8x32xf32>
    %cst_12 = arith.constant 9.99999974E-6 : f32
    %25 = vector.broadcast %cst_12 : f32 to vector<8x1xf32>
    %26 = arith.addf %22, %25 : vector<8x1xf32>
    %27 = math.rsqrt %26 : vector<8x1xf32>
    %28 = vector.broadcast %27 : vector<8x1xf32> to vector<8x32xf32>
    %29 = arith.mulf %24, %28 : vector<8x32xf32>
    %30 = vector.broadcast %9 : vector<1x32xf32> to vector<8x32xf32>
    %31 = arith.mulf %29, %30 : vector<8x32xf32>
    %32 = vector.broadcast %11 : vector<1x32xf32> to vector<8x32xf32>
    %33 = arith.addf %31, %32 : vector<8x32xf32>
    %34 = arith.truncf %33 : vector<8x32xf32> to vector<8x32xbf16>
    %c0_13 = arith.constant 0 : index
    %c0_14 = arith.constant 0 : index
    %c0_15 = arith.constant 0 : index
    %35 = vector.load %arg7[%c0_13, %c0_14, %c0_15] : memref<1x32x64xbf16, #tpu.memory_space<vmem>>, vector<1x32x64xbf16>
    %36 = vector.shape_cast %35 : vector<1x32x64xbf16> to vector<32x64xbf16>
    %cst_16 = arith.constant dense<0.000000e+00> : vector<8x64xf32>
    %37 = tpu.matmul %34, %36, %cst_16 {dimension_numbers = #tpu.dot_dimension_numbers<[1], [0], [0], [1], [0, 0, 1, 1], [], []>} : vector<8x32xbf16>, vector<32x64xbf16>, vector<8x64xf32> -> vector<8x64xf32>
    %c0_17 = arith.constant 0 : index
    %c0_18 = arith.constant 0 : index
    %c0_19 = arith.constant 0 : index
    %38 = vector.load %arg8[%c0_17, %c0_18, %c0_19] : memref<1x1x64xf32, #tpu.memory_space<vmem>>, vector<1x1x64xf32>
    %39 = vector.shape_cast %38 : vector<1x1x64xf32> to vector<1x64xf32>
    %40 = vector.broadcast %39 : vector<1x64xf32> to vector<8x64xf32>
    %41 = arith.addf %37, %40 : vector<8x64xf32>
    %42 = vector.extract_strided_slice %41 {offsets = [0, 0], sizes = [8, 32], strides = [1, 1]} : vector<8x64xf32> to vector<8x32xf32>
    %43 = vector.shape_cast %42 : vector<8x32xf32> to vector<8x2x16xf32>
    %44 = tpu.transpose %43, [1, 0, 2] : vector<8x2x16xf32> -> vector<2x8x16xf32>
    %45 = vector.extract_strided_slice %41 {offsets = [0, 32], sizes = [8, 32], strides = [1, 1]} : vector<8x64xf32> to vector<8x32xf32>
    %46 = vector.shape_cast %45 : vector<8x32xf32> to vector<8x2x16xf32>
    %47 = tpu.transpose %46, [1, 0, 2] : vector<8x2x16xf32> -> vector<2x8x16xf32>
    %48 = arith.truncf %44 : vector<2x8x16xf32> to vector<2x8x16xbf16>
    %c0_20 = arith.constant 0 : index
    %49 = arith.index_cast %4 : i32 to index
    %c0_21 = arith.constant 0 : index
    %50 = vector.load %arg18[%c0_20, %49, %c0_21] : memref<2x8x16xbf16, #tpu.memory_space<vmem>>, vector<2x8x16xbf16>
    tpu.vector_store %arg18[%c0_20, %49, %c0_21], %48 {strides = array<i32>} : memref<2x8x16xbf16, #tpu.memory_space<vmem>>, vector<2x8x16xbf16>,
    %51 = arith.truncf %47 : vector<2x8x16xf32> to vector<2x8x16xbf16>
    %c0_22 = arith.constant 0 : index
    %52 = arith.index_cast %4 : i32 to index
    %c0_23 = arith.constant 0 : index
    %53 = vector.load %arg19[%c0_22, %52, %c0_23] : memref<2x8x16xbf16, #tpu.memory_space<vmem>>, vector<2x8x16xbf16>
    tpu.vector_store %arg19[%c0_22, %52, %c0_23], %51 {strides = array<i32>} : memref<2x8x16xbf16, #tpu.memory_space<vmem>>, vector<2x8x16xbf16>,
    %c1_i32 = arith.constant 1 : i32
    %c0_i32_24 = arith.constant 0 : i32
    %c8_i32_25 = arith.constant 8 : i32
    %54 = arith.muli %c0_i32_24, %c8_i32_25 : i32
    %55 = tpu.assume_multiple %54, 8 : i32
    %c0_26 = arith.constant 0 : index
    %56 = arith.index_cast %55 : i32 to index
    %c0_27 = arith.constant 0 : index
    %57 = vector.load %arg17[%c0_26, %56, %c0_27] : memref<1x8x32xf32, #tpu.memory_space<vmem>>, vector<1x8x32xf32>
    %58 = vector.shape_cast %57 : vector<1x8x32xf32> to vector<8x32xf32>
    %c0_28 = arith.constant 0 : index
    %c0_29 = arith.constant 0 : index
    %c0_30 = arith.constant 0 : index
    %59 = vector.load %arg3[%c0_28, %c0_29, %c0_30] : memref<1x1x32xf32, #tpu.memory_space<vmem>>, vector<1x1x32xf32>
    %60 = vector.shape_cast %59 : vector<1x1x32xf32> to vector<1x32xf32>
    %c0_31 = arith.constant 0 : index
    %c0_32 = arith.constant 0 : index
    %c0_33 = arith.constant 0 : index
    %61 = vector.load %arg4[%c0_31, %c0_32, %c0_33] : memref<1x1x32xf32, #tpu.memory_space<vmem>>, vector<1x1x32xf32>
    %62 = vector.shape_cast %61 : vector<1x1x32xf32> to vector<1x32xf32>
    %cst_34 = arith.constant dense<0.000000e+00> : vector<8xf32>
    %63 = vector.multi_reduction <add>, %58, %cst_34 [1] : vector<8x32xf32> to vector<8xf32>
    %64 = vector.shape_cast %63 : vector<8xf32> to vector<8x1xf32>
    %cst_35 = arith.constant 3.200000e+01 : f32
    %65 = vector.broadcast %cst_35 : f32 to vector<8x1xf32>
    %66 = arith.divf %64, %65 : vector<8x1xf32>
    %67 = vector.broadcast %66 : vector<8x1xf32> to vector<8x32xf32>
    %68 = arith.subf %58, %67 : vector<8x32xf32>
    %69 = arith.mulf %68, %68 : vector<8x32xf32>
    %cst_36 = arith.constant dense<0.000000e+00> : vector<8xf32>
    %70 = vector.multi_reduction <add>, %69, %cst_36 [1] : vector<8x32xf32> to vector<8xf32>
    %71 = vector.shape_cast %70 : vector<8xf32> to vector<8x1xf32>
    %cst_37 = arith.constant 3.200000e+01 : f32
    %72 = vector.broadcast %cst_37 : f32 to vector<8x1xf32>
    %73 = arith.divf %71, %72 : vector<8x1xf32>
    %74 = vector.broadcast %66 : vector<8x1xf32> to vector<8x32xf32>
    %75 = arith.subf %58, %74 : vector<8x32xf32>
    %cst_38 = arith.constant 9.99999974E-6 : f32
    %76 = vector.broadcast %cst_38 : f32 to vector<8x1xf32>
    %77 = arith.addf %73, %76 : vector<8x1xf32>
    %78 = math.rsqrt %77 : vector<8x1xf32>
    %79 = vector.broadcast %78 : vector<8x1xf32> to vector<8x32xf32>
    %80 = arith.mulf %75, %79 : vector<8x32xf32>
    %81 = vector.broadcast %60 : vector<1x32xf32> to vector<8x32xf32>
    %82 = arith.mulf %80, %81 : vector<8x32xf32>
    %83 = vector.broadcast %62 : vector<1x32xf32> to vector<8x32xf32>
    %84 = arith.addf %82, %83 : vector<8x32xf32>
    %85 = arith.truncf %84 : vector<8x32xf32> to vector<8x32xbf16>
    %c0_39 = arith.constant 0 : index
    %c0_40 = arith.constant 0 : index
    %c0_41 = arith.constant 0 : index
    %86 = vector.load %arg5[%c0_39, %c0_40, %c0_41] : memref<1x32x32xbf16, #tpu.memory_space<vmem>>, vector<1x32x32xbf16>
    %87 = vector.shape_cast %86 : vector<1x32x32xbf16> to vector<32x32xbf16>
    %cst_42 = arith.constant dense<0.000000e+00> : vector<8x32xf32>
    %88 = tpu.matmul %85, %87, %cst_42 {dimension_numbers = #tpu.dot_dimension_numbers<[1], [0], [0], [1], [0, 0, 1, 1], [], []>} : vector<8x32xbf16>, vector<32x32xbf16>, vector<8x32xf32> -> vector<8x32xf32>
    %c0_43 = arith.constant 0 : index
    %c0_44 = arith.constant 0 : index
    %c0_45 = arith.constant 0 : index
    %89 = vector.load %arg6[%c0_43, %c0_44, %c0_45] : memref<1x1x32xf32, #tpu.memory_space<vmem>>, vector<1x1x32xf32>
    %90 = vector.shape_cast %89 : vector<1x1x32xf32> to vector<1x32xf32>
    %91 = vector.broadcast %90 : vector<1x32xf32> to vector<8x32xf32>
    %92 = arith.addf %88, %91 : vector<8x32xf32>
    %cst_46 = arith.constant 2.500000e-01 : f32
    %93 = vector.broadcast %cst_46 : f32 to vector<8x32xf32>
    %94 = arith.mulf %92, %93 : vector<8x32xf32>
    %95 = vector.shape_cast %94 : vector<8x32xf32> to vector<8x2x16xf32>
    %96 = tpu.transpose %95, [1, 0, 2] : vector<8x2x16xf32> -> vector<2x8x16xf32>
    %97 = arith.truncf %96 : vector<2x8x16xf32> to vector<2x8x16xbf16>
    %c0_47 = arith.constant 0 : index
    %c0_48 = arith.constant 0 : index
    %c0_49 = arith.constant 0 : index
    %98 = vector.load %arg18[%c0_47, %c0_48, %c0_49] : memref<2x8x16xbf16, #tpu.memory_space<vmem>>, vector<2x8x16xbf16>
    "tpu.trace_start"() <{level = 10 : i32, message = "hqd,hkd->hqk"}> : () -> ()
    %cst_50 = arith.constant dense<0.000000e+00> : vector<2x8x8xf32>
    %99 = tpu.matmul %97, %98, %cst_50 {dimension_numbers = #tpu.dot_dimension_numbers<[2], [2], [1], [1], [0, 0, 0, 1, 1, 1], [0], [0]>} : vector<2x8x16xbf16>, vector<2x8x16xbf16>, vector<2x8x8xf32> -> vector<2x8x8xf32>
    "tpu.trace_stop"() : () -> ()
    %100 = tpu.iota {dimensions = array<i32: 0>} : vector<8x8xi32>
    %101 = vector.broadcast %55 : i32 to vector<8x8xi32>
    %102 = arith.addi %101, %100 : vector<8x8xi32>
    %103 = tpu.iota {dimensions = array<i32: 1>} : vector<8x8xi32>
    %104 = arith.cmpi sge, %102, %103 : vector<8x8xi32>
    %105 = vector.shape_cast %104 : vector<8x8xi1> to vector<1x8x8xi1>
    %cst_51 = arith.constant -1.000000e+30 : f32
    %106 = vector.shape_cast %105 : vector<1x8x8xi1> to vector<1x8x8xi1>
    %107 = vector.broadcast %106 : vector<1x8x8xi1> to vector<2x8x8xi1>
    %108 = vector.broadcast %cst_51 : f32 to vector<2x8x8xf32>
    %109 = arith.select %107, %99, %108 : vector<2x8x8xi1>, vector<2x8x8xf32>
    %cst_52 = arith.constant dense<0xFF800000> : vector<2x8xf32>
    %110 = vector.multi_reduction <maximumf>, %109, %cst_52 [2] : vector<2x8x8xf32> to vector<2x8xf32>
    %111 = vector.shape_cast %110 : vector<2x8xf32> to vector<2x8x1xf32>
    %112 = vector.broadcast %111 : vector<2x8x1xf32> to vector<2x8x8xf32>
    %113 = arith.subf %109, %112 : vector<2x8x8xf32>
    %114 = math.exp %113 : vector<2x8x8xf32>
    %cst_53 = arith.constant dense<0.000000e+00> : vector<2x8xf32>
    %115 = vector.multi_reduction <add>, %114, %cst_53 [2] : vector<2x8x8xf32> to vector<2x8xf32>
    %116 = vector.shape_cast %115 : vector<2x8xf32> to vector<2x8x1xf32>
    %117 = tpu.reciprocal %116 {approx = true} : vector<2x8x1xf32> -> vector<2x8x1xf32>
    %118 = vector.broadcast %117 : vector<2x8x1xf32> to vector<2x8x8xf32>
    %119 = arith.mulf %114, %118 : vector<2x8x8xf32>
    %120 = arith.truncf %119 : vector<2x8x8xf32> to vector<2x8x8xbf16>
    %c0_54 = arith.constant 0 : index
    %c0_55 = arith.constant 0 : index
    %c0_56 = arith.constant 0 : index
    %121 = vector.load %arg19[%c0_54, %c0_55, %c0_56] : memref<2x8x16xbf16, #tpu.memory_space<vmem>>, vector<2x8x16xbf16>
    "tpu.trace_start"() <{level = 10 : i32, message = "hqk,hkd->hqd"}> : () -> ()
    %cst_57 = arith.constant dense<0.000000e+00> : vector<2x8x16xf32>
    %122 = tpu.matmul %120, %121, %cst_57 {dimension_numbers = #tpu.dot_dimension_numbers<[2], [1], [1], [2], [0, 0, 0, 1, 1, 2], [0], [0]>} : vector<2x8x8xbf16>, vector<2x8x16xbf16>, vector<2x8x16xf32> -> vector<2x8x16xf32>
    "tpu.trace_stop"() : () -> ()
    %123 = tpu.transpose %122, [1, 0, 2] : vector<2x8x16xf32> -> vector<8x2x16xf32>
    %124 = vector.shape_cast %123 : vector<8x2x16xf32> to vector<8x32xf32>
    %125 = arith.truncf %124 : vector<8x32xf32> to vector<8x32xbf16>
    %c0_58 = arith.constant 0 : index
    %c0_59 = arith.constant 0 : index
    %c0_60 = arith.constant 0 : index
    %126 = vector.load %arg9[%c0_58, %c0_59, %c0_60] : memref<1x32x32xbf16, #tpu.memory_space<vmem>>, vector<1x32x32xbf16>
    %127 = vector.shape_cast %126 : vector<1x32x32xbf16> to vector<32x32xbf16>
    %cst_61 = arith.constant dense<0.000000e+00> : vector<8x32xf32>
    %128 = tpu.matmul %125, %127, %cst_61 {dimension_numbers = #tpu.dot_dimension_numbers<[1], [0], [0], [1], [0, 0, 1, 1], [], []>} : vector<8x32xbf16>, vector<32x32xbf16>, vector<8x32xf32> -> vector<8x32xf32>
    %c0_62 = arith.constant 0 : index
    %c0_63 = arith.constant 0 : index
    %c0_64 = arith.constant 0 : index
    %129 = vector.load %arg10[%c0_62, %c0_63, %c0_64] : memref<1x1x32xf32, #tpu.memory_space<vmem>>, vector<1x1x32xf32>
    %130 = vector.shape_cast %129 : vector<1x1x32xf32> to vector<1x32xf32>
    %131 = vector.broadcast %130 : vector<1x32xf32> to vector<8x32xf32>
    %132 = arith.addf %128, %131 : vector<8x32xf32>
    %133 = arith.addf %58, %132 : vector<8x32xf32>
    %c0_65 = arith.constant 0 : index
    %c0_66 = arith.constant 0 : index
    %c0_67 = arith.constant 0 : index
    %134 = vector.load %arg11[%c0_65, %c0_66, %c0_67] : memref<1x1x32xf32, #tpu.memory_space<vmem>>, vector<1x1x32xf32>
    %135 = vector.shape_cast %134 : vector<1x1x32xf32> to vector<1x32xf32>
    %c0_68 = arith.constant 0 : index
    %c0_69 = arith.constant 0 : index
    %c0_70 = arith.constant 0 : index
    %136 = vector.load %arg12[%c0_68, %c0_69, %c0_70] : memref<1x1x32xf32, #tpu.memory_space<vmem>>, vector<1x1x32xf32>
    %137 = vector.shape_cast %136 : vector<1x1x32xf32> to vector<1x32xf32>
    %cst_71 = arith.constant dense<0.000000e+00> : vector<8xf32>
    %138 = vector.multi_reduction <add>, %133, %cst_71 [1] : vector<8x32xf32> to vector<8xf32>
    %139 = vector.shape_cast %138 : vector<8xf32> to vector<8x1xf32>
    %cst_72 = arith.constant 3.200000e+01 : f32
    %140 = vector.broadcast %cst_72 : f32 to vector<8x1xf32>
    %141 = arith.divf %139, %140 : vector<8x1xf32>
    %142 = vector.broadcast %141 : vector<8x1xf32> to vector<8x32xf32>
    %143 = arith.subf %133, %142 : vector<8x32xf32>
    %144 = arith.mulf %143, %143 : vector<8x32xf32>
    %cst_73 = arith.constant dense<0.000000e+00> : vector<8xf32>
    %145 = vector.multi_reduction <add>, %144, %cst_73 [1] : vector<8x32xf32> to vector<8xf32>
    %146 = vector.shape_cast %145 : vector<8xf32> to vector<8x1xf32>
    %cst_74 = arith.constant 3.200000e+01 : f32
    %147 = vector.broadcast %cst_74 : f32 to vector<8x1xf32>
    %148 = arith.divf %146, %147 : vector<8x1xf32>
    %149 = vector.broadcast %141 : vector<8x1xf32> to vector<8x32xf32>
    %150 = arith.subf %133, %149 : vector<8x32xf32>
    %cst_75 = arith.constant 9.99999974E-6 : f32
    %151 = vector.broadcast %cst_75 : f32 to vector<8x1xf32>
    %152 = arith.addf %148, %151 : vector<8x1xf32>
    %153 = math.rsqrt %152 : vector<8x1xf32>
    %154 = vector.broadcast %153 : vector<8x1xf32> to vector<8x32xf32>
    %155 = arith.mulf %150, %154 : vector<8x32xf32>
    %156 = vector.broadcast %135 : vector<1x32xf32> to vector<8x32xf32>
    %157 = arith.mulf %155, %156 : vector<8x32xf32>
    %158 = vector.broadcast %137 : vector<1x32xf32> to vector<8x32xf32>
    %159 = arith.addf %157, %158 : vector<8x32xf32>
    %160 = arith.truncf %159 : vector<8x32xf32> to vector<8x32xbf16>
    %c0_76 = arith.constant 0 : index
    %c0_77 = arith.constant 0 : index
    %c0_78 = arith.constant 0 : index
    %161 = vector.load %arg13[%c0_76, %c0_77, %c0_78] : memref<1x32x128xbf16, #tpu.memory_space<vmem>>, vector<1x32x128xbf16>
    %162 = vector.shape_cast %161 : vector<1x32x128xbf16> to vector<32x128xbf16>
    %cst_79 = arith.constant dense<0.000000e+00> : vector<8x128xf32>
    %163 = tpu.matmul %160, %162, %cst_79 {dimension_numbers = #tpu.dot_dimension_numbers<[1], [0], [0], [1], [0, 0, 1, 1], [], []>} : vector<8x32xbf16>, vector<32x128xbf16>, vector<8x128xf32> -> vector<8x128xf32>
    %c0_80 = arith.constant 0 : index
    %c0_81 = arith.constant 0 : index
    %c0_82 = arith.constant 0 : index
    %164 = vector.load %arg14[%c0_80, %c0_81, %c0_82] : memref<1x1x128xf32, #tpu.memory_space<vmem>>, vector<1x1x128xf32>
    %165 = vector.shape_cast %164 : vector<1x1x128xf32> to vector<1x128xf32>
    %166 = vector.broadcast %165 : vector<1x128xf32> to vector<8x128xf32>
    %167 = arith.addf %163, %166 : vector<8x128xf32>
    %cst_83 = arith.constant 5.000000e-01 : f32
    %168 = vector.broadcast %cst_83 : f32 to vector<8x128xf32>
    %169 = arith.mulf %168, %167 : vector<8x128xf32>
    %cst_84 = arith.constant 4.471500e-02 : f32
    %170 = vector.broadcast %cst_84 : f32 to vector<8x128xf32>
    %171 = arith.mulf %170, %167 : vector<8x128xf32>
    %172 = arith.mulf %171, %167 : vector<8x128xf32>
    %173 = arith.mulf %172, %167 : vector<8x128xf32>
    %174 = arith.addf %167, %173 : vector<8x128xf32>
    %cst_85 = arith.constant 0.797884583 : f32
    %175 = vector.broadcast %cst_85 : f32 to vector<8x128xf32>
    %176 = arith.mulf %175, %174 : vector<8x128xf32>
    %177 = math.tanh %176 : vector<8x128xf32>
    %cst_86 = arith.constant 1.000000e+00 : f32
    %178 = vector.broadcast %cst_86 : f32 to vector<8x128xf32>
    %179 = arith.addf %178, %177 : vector<8x128xf32>
    %180 = arith.mulf %169, %179 : vector<8x128xf32>
    %181 = arith.truncf %180 : vector<8x128xf32> to vector<8x128xbf16>
    %c0_87 = arith.constant 0 : index
    %c0_88 = arith.constant 0 : index
    %c0_89 = arith.constant 0 : index
    %182 = vector.load %arg15[%c0_87, %c0_88, %c0_89] : memref<1x128x32xbf16, #tpu.memory_space<vmem>>, vector<1x128x32xbf16>
    %183 = vector.shape_cast %182 : vector<1x128x32xbf16> to vector<128x32xbf16>
    %cst_90 = arith.constant dense<0.000000e+00> : vector<8x32xf32>
    %184 = tpu.matmul %181, %183, %cst_90 {dimension_numbers = #tpu.dot_dimension_numbers<[1], [0], [0], [1], [0, 0, 1, 1], [], []>} : vector<8x128xbf16>, vector<128x32xbf16>, vector<8x32xf32> -> vector<8x32xf32>
    %c0_91 = arith.constant 0 : index
    %c0_92 = arith.constant 0 : index
    %c0_93 = arith.constant 0 : index
    %185 = vector.load %arg16[%c0_91, %c0_92, %c0_93] : memref<1x1x32xf32, #tpu.memory_space<vmem>>, vector<1x1x32xf32>
    %186 = vector.shape_cast %185 : vector<1x1x32xf32> to vector<1x32xf32>
    %187 = vector.broadcast %186 : vector<1x32xf32> to vector<8x32xf32>
    %188 = arith.addf %184, %187 : vector<8x32xf32>
    %189 = arith.addf %133, %188 : vector<8x32xf32>
    %c0_94 = arith.constant 0 : index
    %190 = arith.index_cast %55 : i32 to index
    %c0_95 = arith.constant 0 : index
    %191 = vector.load %arg17[%c0_94, %190, %c0_95] : memref<1x8x32xf32, #tpu.memory_space<vmem>>, vector<1x8x32xf32>
    %192 = vector.shape_cast %191 : vector<1x8x32xf32> to vector<8x32xf32>
    %193 = vector.shape_cast %189 : vector<8x32xf32> to vector<1x8x32xf32>
    tpu.vector_store %arg17[%c0_94, %190, %c0_95], %193 {strides = array<i32>} : memref<1x8x32xf32, #tpu.memory_space<vmem>>, vector<1x8x32xf32>,
    %c1_i32_96 = arith.constant 1 : i32
    return
  }
  func.func @transform_0(%arg0: i32, %arg1: i32) -> (i32, i32, i32) {
    %c0_i32 = arith.constant 0 : i32
    %c0_i32_0 = arith.constant 0 : i32
    %c0_i32_1 = arith.constant 0 : i32
    return %arg0, %c0_i32, %c0_i32_0 : i32, i32, i32
  }
  func.func @transform_1(%arg0: i32, %arg1: i32) -> (i32, i32, i32) {
    %c0_i32 = arith.constant 0 : i32
    %c0_i32_0 = arith.constant 0 : i32
    %c0_i32_1 = arith.constant 0 : i32
    return %arg1, %c0_i32, %c0_i32_0 : i32, i32, i32
  }
  func.func @transform_2(%arg0: i32, %arg1: i32) -> (i32, i32, i32) {
    %c0_i32 = arith.constant 0 : i32
    %c0_i32_0 = arith.constant 0 : i32
    %c0_i32_1 = arith.constant 0 : i32
    return %arg1, %c0_i32, %c0_i32_0 : i32, i32, i32
  }
  func.func @transform_3(%arg0: i32, %arg1: i32) -> (i32, i32, i32) {
    %c0_i32 = arith.constant 0 : i32
    %c0_i32_0 = arith.constant 0 : i32
    %c0_i32_1 = arith.constant 0 : i32
    return %arg1, %c0_i32, %c0_i32_0 : i32, i32, i32
  }
  func.func @transform_4(%arg0: i32, %arg1: i32) -> (i32, i32, i32) {
    %c0_i32 = arith.constant 0 : i32
    %c0_i32_0 = arith.constant 0 : i32
    %c0_i32_1 = arith.constant 0 : i32
    return %arg1, %c0_i32, %c0_i32_0 : i32, i32, i32
  }
  func.func @transform_5(%arg0: i32, %arg1: i32) -> (i32, i32, i32) {
    %c0_i32 = arith.constant 0 : i32
    %c0_i32_0 = arith.constant 0 : i32
    %c0_i32_1 = arith.constant 0 : i32
    return %arg1, %c0_i32, %c0_i32_0 : i32, i32, i32
  }
  func.func @transform_6(%arg0: i32, %arg1: i32) -> (i32, i32, i32) {
    %c0_i32 = arith.constant 0 : i32
    %c0_i32_0 = arith.constant 0 : i32
    %c0_i32_1 = arith.constant 0 : i32
    return %arg1, %c0_i32, %c0_i32_0 : i32, i32, i32
  }
  func.func @transform_7(%arg0: i32, %arg1: i32) -> (i32, i32, i32) {
    %c0_i32 = arith.constant 0 : i32
    %c0_i32_0 = arith.constant 0 : i32
    %c0_i32_1 = arith.constant 0 : i32
    return %arg1, %c0_i32, %c0_i32_0 : i32, i32, i32
  }
  func.func @transform_8(%arg0: i32, %arg1: i32) -> (i32, i32, i32) {
    %c0_i32 = arith.constant 0 : i32
    %c0_i32_0 = arith.constant 0 : i32
    %c0_i32_1 = arith.constant 0 : i32
    return %arg1, %c0_i32, %c0_i32_0 : i32, i32, i32
  }
  func.func @transform_9(%arg0: i32, %arg1: i32) -> (i32, i32, i32) {
    %c0_i32 = arith.constant 0 : i32
    %c0_i32_0 = arith.constant 0 : i32
    %c0_i32_1 = arith.constant 0 : i32
    return %arg1, %c0_i32, %c0_i32_0 : i32, i32, i32
  }
  func.func @transform_10(%arg0: i32, %arg1: i32) -> (i32, i32, i32) {
    %c0_i32 = arith.constant 0 : i32
    %c0_i32_0 = arith.constant 0 : i32
    %c0_i32_1 = arith.constant 0 : i32
    return %arg1, %c0_i32, %c0_i32_0 : i32, i32, i32
  }
  func.func @transform_11(%arg0: i32, %arg1: i32) -> (i32, i32, i32) {
    %c0_i32 = arith.constant 0 : i32
    %c0_i32_0 = arith.constant 0 : i32
    %c0_i32_1 = arith.constant 0 : i32
    return %arg1, %c0_i32, %c0_i32_0 : i32, i32, i32
  }
  func.func @transform_12(%arg0: i32, %arg1: i32) -> (i32, i32, i32) {
    %c0_i32 = arith.constant 0 : i32
    %c0_i32_0 = arith.constant 0 : i32
    %c0_i32_1 = arith.constant 0 : i32
    return %arg1, %c0_i32, %c0_i32_0 : i32, i32, i32
  }
  func.func @transform_13(%arg0: i32, %arg1: i32) -> (i32, i32, i32) {
    %c0_i32 = arith.constant 0 : i32
    %c0_i32_0 = arith.constant 0 : i32
    %c0_i32_1 = arith.constant 0 : i32
    return %arg1, %c0_i32, %c0_i32_0 : i32, i32, i32
  }
  func.func @transform_14(%arg0: i32, %arg1: i32) -> (i32, i32, i32) {
    %c0_i32 = arith.constant 0 : i32
    %c0_i32_0 = arith.constant 0 : i32
    %c0_i32_1 = arith.constant 0 : i32
    return %arg1, %c0_i32, %c0_i32_0 : i32, i32, i32
  }
  func.func @transform_15(%arg0: i32, %arg1: i32) -> (i32, i32, i32) {
    %c0_i32 = arith.constant 0 : i32
    %c0_i32_0 = arith.constant 0 : i32
    %c0_i32_1 = arith.constant 0 : i32
    return %arg0, %c0_i32, %c0_i32_0 : i32, i32, i32
  }
}

module attributes {stable_mosaic.version = 11 : i64} {
  func.func @lnf_kernel(%arg0: i32, %arg1: memref<16x32xf32, #tpu.memory_space<vmem>>, %arg2: memref<1x32xf32, #tpu.memory_space<vmem>>, %arg3: memref<1x32xf32, #tpu.memory_space<vmem>>, %arg4: memref<16x32xbf16, #tpu.memory_space<vmem>>) attributes {dimension_semantics = [#tpu.dimension_semantics<parallel>], iteration_bounds = array<i64: 1>, scalar_prefetch = 0 : i64, scratch_operands = 0 : i64, tpu.core_type = #tpu.core_type<tc>, window_params = [{transform_indices = @transform_0, window_bounds = array<i64: 16, 32>}, {pipeline_mode = #tpu.pipeline_mode<synchronous>, transform_indices = @transform_1, window_bounds = array<i64: 1, 32>}, {pipeline_mode = #tpu.pipeline_mode<synchronous>, transform_indices = @transform_2, window_bounds = array<i64: 1, 32>}, {transform_indices = @transform_3, window_bounds = array<i64: 16, 32>}]} {
    %c0 = arith.constant 0 : index
    %c0_0 = arith.constant 0 : index
    %0 = vector.load %arg1[%c0, %c0_0] : memref<16x32xf32, #tpu.memory_space<vmem>>, vector<16x32xf32>
    %c0_1 = arith.constant 0 : index
    %c0_2 = arith.constant 0 : index
    %1 = vector.load %arg2[%c0_1, %c0_2] : memref<1x32xf32, #tpu.memory_space<vmem>>, vector<1x32xf32>
    %c0_3 = arith.constant 0 : index
    %c0_4 = arith.constant 0 : index
    %2 = vector.load %arg3[%c0_3, %c0_4] : memref<1x32xf32, #tpu.memory_space<vmem>>, vector<1x32xf32>
    %cst = arith.constant dense<0.000000e+00> : vector<16xf32>
    %3 = vector.multi_reduction <add>, %0, %cst [1] : vector<16x32xf32> to vector<16xf32>
    %4 = vector.shape_cast %3 : vector<16xf32> to vector<16x1xf32>
    %cst_5 = arith.constant 3.200000e+01 : f32
    %5 = vector.broadcast %cst_5 : f32 to vector<16x1xf32>
    %6 = arith.divf %4, %5 : vector<16x1xf32>
    %7 = vector.broadcast %6 : vector<16x1xf32> to vector<16x32xf32>
    %8 = arith.subf %0, %7 : vector<16x32xf32>
    %9 = arith.mulf %8, %8 : vector<16x32xf32>
    %cst_6 = arith.constant dense<0.000000e+00> : vector<16xf32>
    %10 = vector.multi_reduction <add>, %9, %cst_6 [1] : vector<16x32xf32> to vector<16xf32>
    %11 = vector.shape_cast %10 : vector<16xf32> to vector<16x1xf32>
    %cst_7 = arith.constant 3.200000e+01 : f32
    %12 = vector.broadcast %cst_7 : f32 to vector<16x1xf32>
    %13 = arith.divf %11, %12 : vector<16x1xf32>
    %14 = vector.broadcast %6 : vector<16x1xf32> to vector<16x32xf32>
    %15 = arith.subf %0, %14 : vector<16x32xf32>
    %cst_8 = arith.constant 9.99999974E-6 : f32
    %16 = vector.broadcast %cst_8 : f32 to vector<16x1xf32>
    %17 = arith.addf %13, %16 : vector<16x1xf32>
    %18 = math.rsqrt %17 : vector<16x1xf32>
    %19 = vector.broadcast %18 : vector<16x1xf32> to vector<16x32xf32>
    %20 = arith.mulf %15, %19 : vector<16x32xf32>
    %21 = vector.broadcast %1 : vector<1x32xf32> to vector<16x32xf32>
    %22 = arith.mulf %20, %21 : vector<16x32xf32>
    %23 = vector.broadcast %2 : vector<1x32xf32> to vector<16x32xf32>
    %24 = arith.addf %22, %23 : vector<16x32xf32>
    %25 = arith.truncf %24 : vector<16x32xf32> to vector<16x32xbf16>
    %c0_9 = arith.constant 0 : index
    %c0_10 = arith.constant 0 : index
    %26 = vector.load %arg4[%c0_9, %c0_10] : memref<16x32xbf16, #tpu.memory_space<vmem>>, vector<16x32xbf16>
    tpu.vector_store %arg4[%c0_9, %c0_10], %25 {strides = array<i32>} : memref<16x32xbf16, #tpu.memory_space<vmem>>, vector<16x32xbf16>,
    return
  }
  func.func @transform_0(%arg0: i32) -> (i32, i32) {
    %c0_i32 = arith.constant 0 : i32
    %c0_i32_0 = arith.constant 0 : i32
    return %arg0, %c0_i32 : i32, i32
  }
  func.func @transform_1(%arg0: i32) -> (i32, i32) {
    %c0_i32 = arith.constant 0 : i32
    %c0_i32_0 = arith.constant 0 : i32
    %c0_i32_1 = arith.constant 0 : i32
    return %c0_i32, %c0_i32_0 : i32, i32
  }
  func.func @transform_2(%arg0: i32) -> (i32, i32) {
    %c0_i32 = arith.constant 0 : i32
    %c0_i32_0 = arith.constant 0 : i32
    %c0_i32_1 = arith.constant 0 : i32
    return %c0_i32, %c0_i32_0 : i32, i32
  }
  func.func @transform_3(%arg0: i32) -> (i32, i32) {
    %c0_i32 = arith.constant 0 : i32
    %c0_i32_0 = arith.constant 0 : i32
    return %arg0, %c0_i32 : i32, i32
  }
}

</mosaic_0001>

<bundles_post_ra>
// kernel: gpt_forward.5
= control target key start
LH: loop header
LB: loop body
LE: loop exit
PB: predicated region body
PF: predicated region fallthrough
CT: control target
= control target key end

     0   :  { %v152_v2 = vmov 0   ;;  %s198_s0 = inlined_call_operand.vmem [shape: bf16[16,32], index: 0, kind: input, shape index: {}]   ;;  %s199_s1 = inlined_call_operand.vmem [shape: bf16[32,256], index: 1, kind: input, shape index: {}]   ;;  %s200_s2 = inlined_call_operand.hbm [shape: f32[16,256], index: 2, kind: output, shape index: {}]  }
   0x1   :  { %v121_v0 = vld [vmem:[%s199_s1 + $0x4] ss:$8 sps:$4 sm:$0xff]   ;;  %v123_v1 = vld [vmem:[%s199_s1] ss:$8 sps:$4 sm:$0xff]   ;;  %80 = vmatprep.mubr.bf16.mxu0 %v152_v2  ;;  %v124_v3 = vld [vmem:[%s199_s1 + $0x14] ss:$8 sps:$4 sm:$0xff]  }
   0x2   :  { %48 = vmatprep.subr.bf16.mxu0 %v121_v0  ;;  %v126_v4 = vld [vmem:[%s199_s1 + $0x10] ss:$8 sps:$4 sm:$0xff]  }
   0x3   :  { %49 = vmatpush1.bf16.msra.mxu0 %v123_v1 }
   0x4   :  { %7 = vsyncpa [#allocation3], 0  ;;  %50 = vmatprep.subr.bf16.mxu0 %v124_v3  ;;  %v127_v5 = vld [vmem:[%s198_s0] sm:$0xff]   ;;  %vm44_vm0 = vcmask 261120   ;;  %s153_s19 = smov [#allocation2]  }
   0x5   :  { %s100_s20 = sshll.u32 %s153_s19, 4  ;;  %s101_s20 = int_to_ptr.vmem [resolvable:$true] %s100_s20 }
   0x6   :  { %s128_s1 = scalar_lea.vmem %s101_s20, 512  ;;  %p133_p1 = scmp.lt.s32.totalorder %s101_s20, %s101_s20 }
   0x7   :  { %51 = vmatpush1.bf16.msra.mxu0 %v126_v4  ;;  %p129_p0 = scmp.ne.s32.totalorder %s101_s20, %s128_s1  ;;  %p134_p2 = scmp.lt.s32.totalorder %s128_s1, %s128_s1 }
   0x9   :  { %p135_p3 = por %p134_p2, %p133_p1 }
   0xa   :  { %116 = vmatmul.mubr.msk.bf16.vlgmr.msra.gmra.mrb[0].mxu0 %vm44_vm0, %v127_v5 }
   0xb   :  { %p136_p4 = pnand %p135_p3, %p129_p0 }
  0xdd   :  { %v82_v6 = vpop.f32.mrb[0].mxu0 }
  0xde   :  { %91 = vst [vmem:[#allocation2] sm:$0xff] %v82_v6  ;;  %v84_v7 = vpop.f32.mrb[1].mxu0 }
  0xdf   :  { %92 = vst [vmem:[#allocation2 + $0x8] sm:$0xff] %v84_v7  ;;  %v86_v8 = vpop.f32.mrb[2].mxu0 }
  0xe0   :  { %93 = vst [vmem:[#allocation2 + $0x10] sm:$0xff] %v86_v8  ;;  %v88_v9 = vpop.f32.mrb[3].mxu0 }
  0xe1   :  { %94 = vst [vmem:[#allocation2 + $0x18] sm:$0xff] %v88_v9 }
  0xe2   :  { %139 = shalt.err (!%p136_p4)
}
  0xe3   :  { %s140_s22 = scalar_lea.hbm %s200_s2, 512 }
  0xe4   :  { %p141_p5 = scmp.ne.s32.totalorder %s200_s2, %s140_s22  ;;  %p144_p6 = scmp.lt.u32.totalorder %s140_s22, %s200_s2 }
  0xe6   :  { %p146_p7 = pnand %p144_p6, %p141_p5 }
  0xe8   :  { %149 = shalt.err (!%p146_p7)
}
  0xe9   :  { %s154_s27 = smov 256   ;;  %s155_s28 = smov 16  }
  0xea   :  { %106 = dma.vmem_to_hbm [thread:$0]  %s101_s20, 512, %s200_s2, [#allocation3], %s154_s27, %s154_s27, %s155_s28  }
  0xeb   :  { %150 = dma.done.wait [#allocation3], 512  }
  0xec   :  { %151 = vsyncadd [#allocation3], 4294966784 }
  0xed   :  { %110 = vsyncpa [#allocation3], 1 }

// kernel: gpt_forward.4
= control target key start
LH: loop header
LB: loop body
LE: loop exit
PB: predicated region body
PF: predicated region fallthrough
CT: control target
= control target key end

     0   :  { %vm18_vm0 = vcmask 261120   ;;  %vm70_vm1 = vcmask 257024   ;;  %s129_s0 = inlined_call_operand.vmem [shape: f32[16,32], index: 0, kind: input, shape index: {}]   ;;  %s130_s1 = inlined_call_operand.vmem [shape: f32[1,32], index: 1, kind: input, shape index: {}]   ;;  %s131_s2 = inlined_call_operand.vmem [shape: f32[1,32], index: 2, kind: input, shape index: {}]   ;;  %s132_s3 = inlined_call_operand.vmem [shape: bf16[16,32], index: 3, kind: output, shape index: {}]  }
   0x1   :  { %v14_v0 = vld [vmem:[%s129_s0] sm:$0xff]  ;;  %v15_v1 = vld [vmem:[%s129_s0 + $0x8] sm:$0xff] }
   0x2   :  { %v19_v2 = vsel %vm18_vm0, %v14_v0, 0.0  ;;  %v22_v3 = vsel %vm18_vm0, %v15_v1, 0.0  ;;  %v77_v21 = vld [vmem:[%s130_s1] ss:$0 sm:$0xff] }
   0x3   :  { %20 = vadd.xlane.f32.xlu0 %v19_v2  ;;  %v78_v23 = vld [vmem:[%s131_s2] ss:$0 sm:$0xff] }
   0x7   :  { %23 = vadd.xlane.f32.xlu0 %v22_v3 }
  0x90   :  { %v21_v4 = vpop.xlane.xlu0 %20 }
  0x91   :  { %v26_v5 = vmul.f32 0.03125, %v21_v4 }
  0x93   :  { %v28_v6 = vsub.f32 %v14_v0, %v26_v5 }
  0x94   :  { %v24_v7 = vpop.xlane.xlu0 %23 }
  0x95   :  { %v27_v8 = vmul.f32 0.03125, %v24_v7  ;;  %v30_v9 = vmul.f32 %v28_v6, %v28_v6 }
  0x97   :  { %v29_v10 = vsub.f32 %v15_v1, %v27_v8  ;;  %v32_v11 = vsel %vm18_vm0, %v30_v9, 0.0 }
  0x98   :  { %33 = vadd.xlane.f32.xlu1 %v32_v11 }
  0x99   :  { %v31_v12 = vmul.f32 %v29_v10, %v29_v10 }
  0x9b   :  { %v35_v13 = vsel %vm18_vm0, %v31_v12, 0.0 }
  0x9c   :  { %36 = vadd.xlane.f32.xlu1 %v35_v13 }
 0x125   :  { %v34_v14 = vpop.xlane.xlu1 %33 }
 0x126   :  { %v38_v15 = vmul.f32 0.03125, %v34_v14 }
 0x128   :  { %v40_v16 = vadd.f32 1e-05, %v38_v15 }
 0x129   :  { %v37_v17 = vpop.xlane.xlu1 %36 }
 0x12a   :  { %83 = vrsqrt.f32 %v40_v16  ;;  %v39_v18 = vmul.f32 0.03125, %v37_v17 }
 0x12c   :  { %v41_v19 = vadd.f32 1e-05, %v39_v18 }
 0x12e   :  { %85 = vrsqrt.f32 %v41_v19 }
 0x134   :  { %v84_v20 = vpop.eup %83 }
 0x135   :  { %v44_v22 = vmul.f32 %v84_v20, %v28_v6 }
 0x137   :  { %v52_v24 = vmul.f32 %v77_v21, %v44_v22 }
 0x138   :  { %v86_v25 = vpop.eup %85 }
 0x139   :  { %v60_v26 = vadd.f32 %v78_v23, %v52_v24  ;;  %v45_v27 = vmul.f32 %v86_v25, %v29_v10 }
 0x13b   :  { %v81_v28 = vpack.c.bf16 %v60_v26, %v60_v26  ;;  %v53_v29 = vmul.f32 %v77_v21, %v45_v27 }
 0x13d   :  { %71 = vst.msk [vmem:[%s132_s3] sm:$0xf] %vm70_vm1, %v81_v28  ;;  %v61_v30 = vadd.f32 %v78_v23, %v53_v29 }
 0x13f   :  { %v82_v31 = vpack.c.bf16 %v61_v30, %v61_v30 }
 0x141   :  { %72 = vst.msk [vmem:[%s132_s3 + $0x4] sm:$0xf] %vm70_vm1, %v82_v31 }

// kernel: gpt_forward.3
= control target key start
LH: loop header
LB: loop body
LE: loop exit
PB: predicated region body
PF: predicated region fallthrough
CT: control target
= control target key end

     0   :  { %s2524_s18 = smov 0   ;;  %s2526_s19 = smov 0   ;;  %s2871_s0 = inlined_call_operand.vmem [shape: f32[2,8,32], index: 0, kind: input, shape index: {}, may-alias: {0,15}]   ;;  %s2872_s1 = inlined_call_operand.vmem [shape: f32[2,1,32], index: 1, kind: input, shape index: {}]   ;;  %s2873_s2 = inlined_call_operand.vmem [shape: f32[2,1,32], index: 2, kind: input, shape index: {}]   ;;  %s2874_s3 = inlined_call_operand.vmem [shape: bf16[2,32,32], index: 3, kind: input, shape index: {}]   ;;  %s2875_s4 = inlined_call_operand.vmem [shape: f32[2,1,32], index: 4, kind: input, shape index: {}]   ;;  %s2876_s5 = inlined_call_operand.vmem [shape: bf16[2,32,64], index: 5, kind: input, shape index: {}]   ;;  %s2877_s6 = inlined_call_operand.vmem [shape: f32[2,1,64], index: 6, kind: input, shape index: {}]   ;;  %s2878_s7 = inlined_call_operand.vmem [shape: bf16[2,32,32], index: 7, kind: input, shape index: {}]   ;;  %s2879_s8 = inlined_call_operand.vmem [shape: f32[2,1,32], index: 8, kind: input, shape index: {}]   ;;  %s2880_s9 = inlined_call_operand.vmem [shape: f32[2,1,32], index: 9, kind: input, shape index: {}]   ;;  %s2881_s10 = inlined_call_operand.vmem [shape: f32[2,1,32], index: 10, kind: input, shape index: {}]   ;;  %s2882_s11 = inlined_call_operand.vmem [shape: bf16[2,32,128], index: 11, kind: input, shape index: {}]   ;;  %s2883_s12 = inlined_call_operand.vmem [shape: f32[2,1,128], index: 12, kind: input, shape index: {}]   ;;  %s2884_s13 = inlined_call_operand.vmem [shape: bf16[2,128,32], index: 13, kind: input, shape index: {}]   ;;  %s2885_s14 = inlined_call_operand.vmem [shape: f32[2,1,32], index: 14, kind: input, shape index: {}]   ;;  %s2886_s15 = inlined_call_operand.vmem [shape: f32[2,8,32], index: 15, kind: output, shape index: {}, may-alias: {0,15}]  }
   0x1   :  { %2891 = sst [smem:[#allocation10_spill]] %s2871_s0  ;;  %s2528_s20 = smov 0  }
   0x2   :  { %2892 = sst [smem:[#allocation11_spill]] %s2874_s3  ;;  %s2530_s21 = smov 0  }
   0x3   :  { %2893 = sst [smem:[#allocation12_spill]] %s2875_s4  ;;  %s2532_s22 = smov 0  }
   0x4   :  { %2894 = sst [smem:[#allocation13_spill]] %s2876_s5 }
   0x5   :  { %2895 = sst [smem:[#allocation14_spill]] %s2878_s7 }
   0x6   :  { %2896 = sst [smem:[#allocation15_spill]] %s2879_s8 }
   0x7   :  { %2897 = sst [smem:[#allocation16_spill]] %s2880_s9 }
   0x8   :  { %2898 = sst [smem:[#allocation17_spill]] %s2884_s13 }
   0x9   :  { %2899 = sst [smem:[#allocation18_spill]] %s2885_s14 }
   0xa   :  { %2900 = sst [smem:[#allocation19_spill]] %s2886_s15 }
   0xb LB: > { %2901 = sst [smem:[#allocation4_spill]] %s2419_s18  ;;  %s34_s23 = sadd.s32 1, %s2427_s20  ;;  %s2435_s22 = sphi %s2532_s22, %s25_s22   ;;  %s2431_s21 = sphi %s2530_s21, %s2933_s21   ;;  %s2427_s20 = sphi %s2528_s20, %s2932_s20   ;;  %s2423_s19 = sphi %s2526_s19, %s2931_s19   ;;  %s2419_s18 = sphi %s2524_s18, %s2930_s18  }
   0xc   : > { %2902 = sst [smem:[#allocation5_spill]] %s2427_s20  ;;  %s37_s24 = sadd.s32 1, %s2431_s21 }
   0xd   : > { %2903 = sst [smem:[#allocation6_spill]] %s2431_s21  ;;  %p35_p0 = scmp.ge.s32.totalorder %s34_s23, 2 }
   0xe   : > { %2904 = sst [smem:[#allocation7_spill]] %s2435_s22  ;;  %p2149_p1 = scmp.ge.s32.totalorder %s2435_s22, 1 }
   0xf   : > { %p570_p2 = scmp.lt.s32.totalorder %s2435_s22, 5  ;;  %s2935_s23 = smov (%p35_p0, %s34_s23), 0 }
  0x10   : > { %2905 = sst [smem:[#allocation8_spill]] %s2935_s23  ;;  %s2937_s24 = smov (!%p35_p0, %s37_s24), %s2431_s21 }
  0x11   : > { %p571_p3 = pnand %p2149_p1, %p570_p2  ;;  %p39_p4 = scmp.ge.s32.totalorder %s2937_s24, 2 }
  0x12   : > { %p668_p5 = scmp.lt.s32.totalorder (!%p571_p3), %s2423_s19, 1  ;;  %p672_p6 = scmp.lt.s32.totalorder (!%p571_p3), %s2419_s18, 1 }
  0x13   : > { %s2939_s24 = smov (%p39_p4, %s2937_s24), 0  ;;  %574 = sbr.rel (%p571_p3) target bundleno = 2604 (0xa2c), region = 80 }
  0x14   : > { %2906 = sst [smem:[#allocation9_spill]] %s2939_s24  ;;  %s2907_s0 = sld [smem:[#allocation10_spill]] (!%p571_p3) }
  0x15   : > { %s2908_s3 = sld [smem:[#allocation11_spill]] (!%p571_p3)  ;;  %s2910_s5 = sld [smem:[#allocation13_spill]] (!%p571_p3) }
  0x16   : > { %s2911_s7 = sld [smem:[#allocation14_spill]] (!%p571_p3)  ;;  %s2915_s27 = sld [smem:[#allocation17_spill]] (!%p571_p3) }
  0x1a   : > { %s2941_s19 = smov (!%p668_p5, %s2423_s19), 1 }
  0x1b   : > { %s2558_s25 = scalar_select %p672_p6, %s2419_s18, 1 }
  0x1c   : > { %s2150_s26 = sshll.u32 %s2941_s19, 3 }
  0x1d   : > { %s671_s29 = scalar_lea.vmem %s2907_s0, %s2150_s26  ;;  %s2208_s20 = sshll.u32 %s2558_s25, 4 }
  0x1e   : > { %s2575_s15 = scalar_lea.vmem %s2908_s3, %s2208_s20  ;;  %s2584_s14 = scalar_lea.vmem %s2910_s5, %s2208_s20 }
  0x1f   : > { %s2593_s17 = scalar_lea.vmem %s2911_s7, %s2208_s20  ;;  %s2610_s16 = scalar_lea.vmem %s2882_s11, %s2208_s20 }
  0x20   : > { %s715_s23 = scalar_lea.vmem %s2883_s12, %s2558_s25  ;;  %s2212_s7 = sshll.u32 %s2558_s25, 6 }
  0x21   : > { %s2914_s3 = sld [smem:[#allocation18_spill]]  ;;  %s2624_s9 = scalar_lea.vmem %s2915_s27, %s2212_s7 }
  0x22   : > { %s2916_s5 = sld [smem:[#allocation19_spill]]  ;;  %s2917_s20 = sld [smem:[#allocation4_spill]] }
  0x27   : > { %s723_s8 = scalar_lea.vmem %s2914_s3, %s2558_s25 }
  0x28   : > { %s2629_s4 = scalar_lea.vmem %s2916_s5, %s2150_s26  ;;  %p2162_p7 = scmp.ne.s32.totalorder %s2917_s20, 0 }
  0x29   : > { %v733_v0 = vld [vmem:[%s671_s29] sm:$0xff] (!%p2162_p7)  ;;  %vm734_vm0 = vcmask (!%p2162_p7), 261120  }
  0x2a   : > { %732 = sbr.rel (%p2162_p7) target bundleno = 49 (0x31), region = 84  ;;  %735 = vst.msk [vmem:[%s2629_s4] sm:$0xff] (!%p2162_p7), %vm734_vm0, %v733_v0 }
  0x31 PF: > { %v2634_v1 = vld [vmem:[%s2629_s4] sm:$0xff]  ;;  %vm739_vm1 = vcmask 261120   ;;  %v2437_v14 = vmov 0.0   ;;  %v2366_v15 = vld [vmem:[%s2584_s14 + $0x8] sm:$0xff]   ;;  %vm2438_vm2 = vmmov 0   ;;  %s2918_s7 = scalar_lea.vmem %s2872_s1, %s2558_s25  ;;  %s2919_s29 = scalar_lea.vmem %s2873_s2, %s2558_s25  ;;  %v843_v51 = vlaneseq }
  0x32   : > { %v740_v2 = vsel %vm739_vm1, %v2634_v1, 0.0  ;;  %v2365_v13 = vld [vmem:[%s2584_s14] sm:$0xff]   ;;  %2242 = vmatprep.subr.bf16.mxu1 %v2437_v14  ;;  %2270 = vmatprep.subr.bf16.mxu0 %v2437_v14  ;;  %v2368_v33 = vld [vmem:[%s2575_s15 + $0x8] sm:$0xff]   ;;  %s2439_s21 = smov 112   ;;  %s2921_s22 = sld [smem:[#allocation12_spill]]  ;;  %vm1079_vm3 = vcmask 125952  }
  0x33   : > { %741 = vadd.xlane.f32.xlu0 %v740_v2  ;;  %2243 = vmatpush3.bf16.msra.mxu1 %v2365_v13  ;;  %v2163_v23 = vld [vmem:[%s2918_s7] ss:$0 sm:$0xff]  ;;  %v2440_v49 = vmov 1983009808   ;;  %v2686_v53 = vshrl.u32 %v843_v51, 7  ;;  %vm1308_vm4 = vcmask 130048   ;;  %s2927_s27 = scalar_lea.vmem %s2881_s10, %s2558_s25 }
  0x34   : > { %2244 = vmatprep.subr.bf16.mxu1 %v2437_v14  ;;  %2246 = vmatprep.mubr.msk.bf16.mxu1 %vm2438_vm2, %v2437_v14  ;;  %v2164_v25 = vld [vmem:[%s2919_s29] ss:$0 sm:$0xff]  ;;  %v841_v50 = vunpack.c.l.s4 %v2440_v49  ;;  %v2441_v54 = vmov 1934713408   ;;  %vm1412_vm6 = vcmask 64512   ;;  %s2442_s19 = smov 96  }
  0x35   : > { %2272 = vmatprep.mubr.msk.bf16.mxu0 %vm2438_vm2, %v2437_v14  ;;  %v2367_v30 = vld [vmem:[%s2575_s15] sm:$0xff]   ;;  %s2920_s15 = scalar_lea.vmem %s2877_s6, %s2558_s25  ;;  %v872_v55 = vunpack.c.l.s4 %v2441_v54  ;;  %vm1442_vm7 = vcmask 1043456   ;;  %s2923_s20 = sld [smem:[#allocation15_spill]] }
  0x36   : > { %v2165_v36 = vld [vmem:[%s2920_s15] ss:$0 sm:$0xff]  ;;  %v842_v52 = vunpack.c.0.s8 %v841_v50  ;;  %s2925_s14 = sld [smem:[#allocation16_spill]] }
  0x37   : > { %1090 = vadd.xlane.f32.xlu0 %v740_v2  ;;  %2245 = vmatpush3.bf16.msra.mxu1 %v2366_v15  ;;  %v873_v57 = vunpack.c.0.s8 %v872_v55 }
  0x38   : > { %2250 = vmatprep.subr.bf16.mxu1 %v2437_v14  ;;  %s2922_s13 = scalar_lea.vmem %s2921_s22, %s2558_s25  ;;  %v2689_v56 = vsub.s32 %v842_v52, %v2686_v53 }
  0x39   : > { %v2175_v42 = vld [vmem:[%s2922_s13] ss:$0 sm:$0xff]  ;;  %v2698_v61 = vsub.s32 %v873_v57, %v2686_v53 }
  0x3b   : > { %s2924_s3 = scalar_lea.vmem %s2923_s20, %s2558_s25 }
  0x3c   : > { %s2926_s26 = scalar_lea.vmem %s2925_s14, %s2558_s25 }
  0xc0   : > { %v742_v3 = vpop.xlane.xlu0 %741 }
  0xc1   : > { %v744_v4 = vmul.f32 0.03125, %v742_v3 }
  0xc3   : > { %v745_v5 = vsub.f32 %v2634_v1, %v744_v4 }
  0xc4   : > { %v1091_v6 = vpop.xlane.xlu0 %1090 }
  0xc5   : > { %v1092_v7 = vmul.f32 0.03125, %v1091_v6  ;;  %v746_v8 = vmul.f32 %v745_v5, %v745_v5 }
  0xc7   : > { %v1093_v9 = vsub.f32 %v2634_v1, %v1092_v7  ;;  %v747_v10 = vsel %vm739_vm1, %v746_v8, 0.0 }
  0xc8   : > { %748 = vadd.xlane.f32.xlu1 %v747_v10 }
  0xc9   : > { %v1094_v11 = vmul.f32 %v1093_v9, %v1093_v9 }
  0xcb   : > { %v1095_v12 = vsel %vm739_vm1, %v1094_v11, 0.0 }
  0xcc   : > { %1096 = vadd.xlane.f32.xlu1 %v1095_v12 }
 0x155   : > { %v749_v16 = vpop.xlane.xlu1 %748 }
 0x156   : > { %v750_v17 = vmul.f32 0.03125, %v749_v16 }
 0x158   : > { %v751_v18 = vadd.f32 1e-05, %v750_v17 }
 0x159   : > { %v1097_v19 = vpop.xlane.xlu1 %1096 }
 0x15a   : > { %2381 = vrsqrt.f32 %v751_v18  ;;  %v1098_v20 = vmul.f32 0.03125, %v1097_v19 }
 0x15c   : > { %v1099_v21 = vadd.f32 1e-05, %v1098_v20 }
 0x15e   : > { %2383 = vrsqrt.f32 %v1099_v21 }
 0x164   : > { %v2382_v22 = vpop.eup %2381 }
 0x165   : > { %v753_v24 = vmul.f32 %v2382_v22, %v745_v5 }
 0x167   : > { %v760_v26 = vmul.f32 %v2163_v23, %v753_v24 }
 0x168   : > { %v2384_v27 = vpop.eup %2383 }
 0x169   : > { %v1101_v28 = vmul.f32 %v2384_v27, %v1093_v9  ;;  %v767_v29 = vadd.f32 %v2164_v25, %v760_v26 }
 0x16b   : > { %v768_v31 = vpack.c.bf16 %v767_v29, %v767_v29  ;;  %v1108_v32 = vmul.f32 %v2163_v23, %v1101_v28 }
 0x16d   : > { %2247 = vmatmul.mubr.msk.bf16.vlgmr.msra.gmra.mrb[0].mxu1 %vm739_vm1, %v768_v31  ;;  %v1115_v34 = vadd.f32 %v2164_v25, %v1108_v32 }
 0x16e   : > { %2251 = vmatpush3.bf16.msra.mxu1 %v2367_v30  ;;  %2254 = vmatprep.mubr.msk.bf16.mxu1 %vm2438_vm2, %v2437_v14 }
 0x16f   : > { %2252 = vmatprep.subr.bf16.mxu1 %v2437_v14  ;;  %v1116_v35 = vpack.c.bf16 %v1115_v34, %v1115_v34 }
 0x172   : > { %2253 = vmatpush3.bf16.msra.mxu1 %v2368_v33 }
 0x173   : > { %2258 = vmatprep.subr.bf16.mxu1 %v2437_v14 }
 0x175   : > { %2255 = vmatmul.mubr.msk.bf16.vlgmr.msra.gmra.mrb[4].mxu1 %vm739_vm1, %v1116_v35 }
 0x176   : > { %2260 = vmatprep.mubr.msk.bf16.mxu1 %vm2438_vm2, %v2437_v14 }
 0x240   : > { %v829_v37 = vpop.f32.mrb[0].mxu1 }
 0x241   : > { %v2677_v38 = vadd.f32 %v2165_v36, %v829_v37  ;;  %v2248_v39 = vpop.f32.mrb[1].mxu1 }
 0x242   : > { %v832_v40 = vpop.f32.mrb[2].mxu1 }
 0x243   : > { %836 = vrot.lane.b32.xlu0 %v2677_v38, %s2439_s21  ;;  %v2249_v41 = vpop.f32.mrb[3].mxu1  ;;  %v839_v58 = vcombine.high %v2677_v38, %v2437_v14  ;;  %v846_v60 = vrot.slane %v2677_v38, %v2689_v56 }
 0x245   : > { %v853_v0 = vrot.slane %v839_v58, %v2689_v56 }
 0x248   : > { %v1177_v43 = vpop.f32.mrb[4].mxu1 }
 0x249   : > { %v1178_v44 = vadd.f32 %v2175_v42, %v1177_v43  ;;  %v2256_v45 = vpop.f32.mrb[5].mxu1 }
 0x24a   : > { %v1180_v46 = vpop.f32.mrb[6].mxu1 }
 0x24b   : > { %v1183_v47 = vmul.f32 0.25, %v1178_v44  ;;  %v2257_v48 = vpop.f32.mrb[7].mxu1 }
 0x24d   : > { %1185 = vrot.lane.b32.xlu1 %v1183_v47, %s2439_s21  ;;  %v1188_v13 = vcombine.high %v1183_v47, %v2437_v14  ;;  %v1195_v24 = vrot.slane %v1183_v47, %v2689_v56 }
 0x24f   : > { %v1202_v26 = vrot.slane %v1188_v13, %v2689_v56 }
 0x2b5   : > { %v2693_v59 = vpop.permute.xlu0 %836 }
 0x2b6   : > { %v854_v62 = vcombine.high %v2693_v59, %v2437_v14  ;;  %v861_v63 = vrot.slane %v2693_v59, %v2689_v56 }
 0x2b8   : > { %v868_v2 = vrot.slane %v854_v62, %v2689_v56  ;;  %v869_v3 = vcombine.low %v846_v60, %v861_v63  ;;  %v870_v4 = vcombine.high %v846_v60, %v861_v63 }
 0x2ba   : > { %v877_v5 = vrot.slane %v869_v3, %v2698_v61  ;;  %v884_v6 = vrot.slane %v870_v4, %v2698_v61  ;;  %v885_v7 = vcombine.low %v853_v0, %v868_v2  ;;  %v886_v8 = vcombine.high %v853_v0, %v868_v2 }
 0x2bc   : > { %v893_v9 = vrot.slane %v885_v7, %v2698_v61  ;;  %v900_v10 = vrot.slane %v886_v8, %v2698_v61  ;;  %v905_v11 = vcombine.low %v877_v5, %v884_v6  ;;  %v2169_v12 = vcombine.high %v877_v5, %v884_v6 }
 0x2bd   : > { %v1406_v6 = vand.u32 127, %v843_v51 }
 0x2be   : > { %v912_v15 = vrot.slane %v905_v11, %v2689_v56  ;;  %v920_v16 = vrot.slane %v2169_v12, %v2689_v56  ;;  %v921_v17 = vcombine.low %v893_v9, %v900_v10  ;;  %v2170_v18 = vcombine.high %v893_v9, %v900_v10 }
 0x2bf   : > { %v1186_v19 = vpop.permute.xlu1 %1185  ;;  %vm1407_vm5 = vcmp.ge.s32.totalorder %v2686_v53, %v1406_v6 }
 0x2c0   : > { %v928_v20 = vrot.slane %v921_v17, %v2689_v56  ;;  %v936_v21 = vrot.slane %v2170_v18, %v2689_v56  ;;  %v937_v22 = vcombine.low %v912_v15, %v920_v16  ;;  %v1203_v23 = vcombine.high %v1186_v19, %v2437_v14 }
 0x2c1   : > { %v1210_v25 = vrot.slane %v1186_v19, %v2689_v56 }
 0x2c2   : > { %v945_v27 = vcombine.low %v928_v20, %v936_v21  ;;  %v1217_v28 = vrot.slane %v1203_v23, %v2689_v56  ;;  %v944_v31 = vrot.slane %v937_v22, %v2698_v61 }
 0x2c3   : > { %v1218_v29 = vcombine.low %v1195_v24, %v1210_v25  ;;  %v1219_v30 = vcombine.high %v1195_v24, %v1210_v25 }
 0x2c4   : > { %v952_v32 = vrot.slane %v945_v27, %v2698_v61  ;;  %v1234_v33 = vcombine.low %v1202_v26, %v1217_v28  ;;  %v1235_v34 = vcombine.high %v1202_v26, %v1217_v28 }
 0x2c5   : > { %v1226_v35 = vrot.slane %v1218_v29, %v2698_v61  ;;  %v1233_v36 = vrot.slane %v1219_v30, %v2698_v61 }
 0x2c6   : > { %v953_v37 = vcombine.low %v944_v31, %v952_v32  ;;  %v954_v39 = vcombine.high %v944_v31, %v952_v32  ;;  %v1242_v40 = vrot.slane %v1234_v33, %v2698_v61  ;;  %v1249_v41 = vrot.slane %v1235_v34, %v2698_v61 }
 0x2c7   : > { %v1254_v42 = vcombine.low %v1226_v35, %v1233_v36  ;;  %v2179_v43 = vcombine.high %v1226_v35, %v1233_v36 }
 0x2c8   : > { %v1077_v44 = vpack.c.bf16 %v953_v37, %v953_v37  ;;  %v1078_v45 = vpack.c.bf16 %v954_v39, %v954_v39  ;;  %v1270_v46 = vcombine.low %v1242_v40, %v1249_v41  ;;  %v2180_v47 = vcombine.high %v1242_v40, %v1249_v41 }
 0x2c9   : > { %v1261_v48 = vrot.slane %v1254_v42, %v2689_v56  ;;  %v1269_v49 = vrot.slane %v2179_v43, %v2689_v56 }
 0x2ca   : > { %1080 = vst.msk [vmem:[#allocation2] sm:$0xf] %vm1079_vm3, %v1077_v44  ;;  %1081 = vst.msk [vmem:[#allocation2 + $0x4] sm:$0xf] %vm1079_vm3, %v1078_v45  ;;  %v1277_v50 = vrot.slane %v1270_v46, %v2689_v56  ;;  %v1285_v52 = vrot.slane %v2180_v47, %v2689_v56 }
 0x2cb   : > { %v1286_v55 = vcombine.low %v1261_v48, %v1269_v49 }
 0x2cc   : > { %v1294_v54 = vcombine.low %v1277_v50, %v1285_v52 }
 0x2cd   : > { %v1293_v60 = vrot.slane %v1286_v55, %v2698_v61 }
 0x2ce   : > { %v1301_v57 = vrot.slane %v1294_v54, %v2698_v61 }
 0x2d0   : > { %v1302_v63 = vcombine.low %v1293_v60, %v1301_v57  ;;  %v1303_v4 = vcombine.high %v1293_v60, %v1301_v57 }
 0x2d1   : > { %v1306_v58 = vld [vmem:[#allocation2] sm:$0xf]  ;;  %v1307_v0 = vld [vmem:[#allocation2 + $0x4] sm:$0xf] }
 0x2d2   : > { %v1313_v62 = vsel %vm1308_vm4, %v1306_v58, 0  ;;  %v1304_v2 = vpack.c.bf16 %v1302_v63, %v1302_v63  ;;  %v1359_v3 = vsel %vm1308_vm4, %v1307_v0, 0  ;;  %v1305_v5 = vpack.c.bf16 %v1303_v4, %v1303_v4 }
 0x2d3   : > { %2259 = vmatpush3.bf16.xpose.msra.mxu1 %v1313_v62 }
 0x2d4   : > { %2264 = vmatprep.subr.bf16.mxu1 %v2437_v14 }
 0x2da   : > { %2261 = vmatmul.mubr.msk.bf16.vlgmr.msra.gmra.mrb[8].mxu1 %vm1308_vm4, %v1304_v2 }
 0x2db   : > { %2265 = vmatpush3.bf16.xpose.msra.mxu1 %v1359_v3  ;;  %2266 = vmatprep.mubr.msk.bf16.mxu1 %vm2438_vm2, %v2437_v14 }
 0x2dc   : > { %2276 = vmatprep.subr.bf16.mxu1 %v2437_v14 }
 0x2e2   : > { %2267 = vmatmul.mubr.msk.bf16.vlgmr.msra.gmra.mrb[12].mxu1 %vm1308_vm4, %v1305_v5 }
 0x2e3   : > { %2278 = vmatprep.mubr.msk.bf16.mxu1 %vm2438_vm2, %v2437_v14 }
 0x3ad   : > { %v1349_v7 = vpop.f32.mrb[8].mxu1 }
 0x3ae   : > { %v1410_v8 = vsel %vm1407_vm5, %v1349_v7, -1e+30  ;;  %v2262_v9 = vpop.f32.mrb[9].mxu1 }
 0x3af   : > { %v1352_v10 = vpop.f32.mrb[10].mxu1  ;;  %v1413_v11 = vsel %vm1412_vm6, %v1410_v8, -inf }
 0x3b0   : > { %1414 = vmax.xlane.f32.xlu1 %v1413_v11  ;;  %v2263_v12 = vpop.f32.mrb[11].mxu1 }
 0x3b5   : > { %v1395_v13 = vpop.f32.mrb[12].mxu1 }
 0x3b6   : > { %v1411_v15 = vsel %vm1407_vm5, %v1395_v13, -1e+30  ;;  %v2268_v16 = vpop.f32.mrb[13].mxu1  ;;  %v2369_v13 = vld [vmem:[%s2593_s17] sm:$0xff]  }
 0x3b7   : > { %v1398_v17 = vpop.f32.mrb[14].mxu1  ;;  %v1416_v18 = vsel %vm1412_vm6, %v1411_v15, -inf }
 0x3b8   : > { %1417 = vmax.xlane.f32.xlu0 %v1416_v18  ;;  %v2269_v19 = vpop.f32.mrb[15].mxu1 }
 0x3c1   : > { %957 = vrot.lane.b32.xlu1 %v2693_v59, %s2442_s19 }
 0x3ce   : > { %955 = vrot.lane.b32.xlu0 %v2677_v38, %s2442_s19 }
 0x43d   : > { %v1415_v51 = vpop.xlane.xlu1 %1414 }
 0x43e   : > { %v1419_v53 = vsub.f32 %v1410_v8, %v1415_v51 }
 0x440   : > { %v1421_v20 = vmul.f32 1.442695, %v1419_v53 }
 0x441   : > { %v958_v21 = vpop.permute.xlu1 %957 }
 0x442   : > { %2385 = vpow2.f32 %v1421_v20  ;;  %v976_v24 = vcombine.high %v958_v21, %v2437_v14  ;;  %v983_v27 = vrot.slane %v958_v21, %v2689_v56 }
 0x444   : > { %v990_v38 = vrot.slane %v976_v24, %v2689_v56 }
 0x445   : > { %v1418_v22 = vpop.xlane.xlu0 %1417 }
 0x446   : > { %v1420_v23 = vsub.f32 %v1411_v15, %v1418_v22 }
 0x448   : > { %v1423_v25 = vmul.f32 1.442695, %v1420_v23 }
 0x449   : > { %v956_v26 = vpop.permute.xlu0 %955 }
 0x44a   : > { %2387 = vpow2.f32 %v1423_v25  ;;  %v961_v28 = vcombine.high %v956_v26, %v2437_v14  ;;  %v968_v59 = vrot.slane %v956_v26, %v2689_v56 }
 0x44c   : > { %v2386_v29 = vpop.eup %2385  ;;  %v975_v30 = vrot.slane %v961_v28, %v2689_v56  ;;  %v991_v31 = vcombine.low %v968_v59, %v983_v27  ;;  %v992_v32 = vcombine.high %v968_v59, %v983_v27 }
 0x44d   : > { %v1425_v33 = vsel %vm1412_vm6, %v2386_v29, 0.0 }
 0x44e   : > { %v999_v34 = vrot.slane %v991_v31, %v2698_v61  ;;  %v1006_v35 = vrot.slane %v992_v32, %v2698_v61  ;;  %v1007_v36 = vcombine.low %v975_v30, %v990_v38  ;;  %v1008_v37 = vcombine.high %v975_v30, %v990_v38  ;;  %1426 = vadd.xlane.f32.xlu1 %v1425_v33  ;;  %v2370_v31 = vld [vmem:[%s2593_s17 + $0x8] sm:$0xff]   ;;  %s2443_s17 = smov 16  }
 0x450   : > { %v1015_v39 = vrot.slane %v1007_v36, %v2698_v61  ;;  %v1022_v40 = vrot.slane %v1008_v37, %v2698_v61  ;;  %v1027_v41 = vcombine.low %v999_v34, %v1006_v35  ;;  %v2171_v42 = vcombine.high %v999_v34, %v1006_v35 }
 0x452   : > { %v1034_v43 = vrot.slane %v1027_v41, %v2689_v56  ;;  %v1042_v44 = vrot.slane %v2171_v42, %v2689_v56  ;;  %v1043_v45 = vcombine.low %v1015_v39, %v1022_v40  ;;  %v2172_v46 = vcombine.high %v1015_v39, %v1022_v40 }
 0x454   : > { %v2388_v47 = vpop.eup %2387  ;;  %v1050_v48 = vrot.slane %v1043_v45, %v2689_v56  ;;  %v1058_v49 = vrot.slane %v2172_v46, %v2689_v56  ;;  %v1059_v50 = vcombine.low %v1034_v43, %v1042_v44 }
 0x455   : > { %v1428_v52 = vsel %vm1412_vm6, %v2388_v47, 0.0 }
 0x456   : > { %v1067_v54 = vcombine.low %v1050_v48, %v1058_v49  ;;  %1429 = vadd.xlane.f32.xlu0 %v1428_v52  ;;  %v1066_v55 = vrot.slane %v1059_v50, %v2698_v61 }
 0x458   : > { %v1074_v57 = vrot.slane %v1067_v54, %v2698_v61 }
 0x45a   : > { %v1075_v58 = vcombine.low %v1066_v55, %v1074_v57  ;;  %v1076_v60 = vcombine.high %v1066_v55, %v1074_v57 }
 0x45c   : > { %v1082_v62 = vpack.c.bf16 %v1075_v58, %v1075_v58  ;;  %v1083_v63 = vpack.c.bf16 %v1076_v60, %v1076_v60 }
 0x45e   : > { %1084 = vst.msk [vmem:[#allocation3] sm:$0xf] %vm1079_vm3, %v1082_v62  ;;  %1085 = vst.msk [vmem:[#allocation3 + $0x4] sm:$0xf] %vm1079_vm3, %v1083_v63 }
 0x465   : > { %v1437_v0 = vld [vmem:[#allocation3] sm:$0xf]  ;;  %v1438_v2 = vld [vmem:[#allocation3 + $0x4] sm:$0xf] }
 0x466   : > { %v1444_v3 = vsel %vm1442_vm7, %v1437_v0, 0  ;;  %v1490_v4 = vsel %vm1442_vm7, %v1438_v2, 0 }
 0x467   : > { %2271 = vmatpush3.bf16.msra.mxu0 %v1444_v3  ;;  %2277 = vmatpush3.bf16.msra.mxu1 %v1490_v4 }
 0x468   : > { %2282 = vmatprep.subr.bf16.mxu0 %v2437_v14  ;;  %2290 = vmatprep.subr.bf16.mxu1 %v2437_v14 }
 0x4db   : > { %v1427_v5 = vpop.xlane.xlu1 %1426 }
 0x4dc   : > { %2389 = vrcp.f32 %v1427_v5  ;;  %v2371_v5 = vld [vmem:[%s2610_s16] sm:$0xff]  }
 0x4e3   : > { %v1430_v6 = vpop.xlane.xlu0 %1429 }
 0x4e4   : > { %2391 = vrcp.f32 %v1430_v6  ;;  %v2372_v6 = vld [vmem:[%s2610_s16 + $0x8] sm:$0xff]  }
 0x4e6   : > { %v2390_v7 = vpop.eup %2389 }
 0x4e7   : > { %v1433_v8 = vmul.f32 %v2390_v7, %v2386_v29 }
 0x4e9   : > { %v1435_v9 = vpack.c.bf16 %v1433_v8, %v1433_v8 }
 0x4eb   : > { %2273 = vmatmul.mubr.msk.bf16.vlgmr.msra.gmra.mrb[0].mxu0 %vm1412_vm6, %v1435_v9 }
 0x4ec   : > { %2286 = vmatprep.mubr.msk.bf16.mxu0 %vm2438_vm2, %v2437_v14  ;;  %2283 = vmatpush3.bf16.msra.mxu0 %v2369_v13  ;;  %v2192_v13 = vld [vmem:[%s2927_s27] ss:$0 sm:$0xff] }
 0x4ed   : > { %2284 = vmatprep.subr.bf16.mxu0 %v2437_v14 }
 0x4ee   : > { %v2392_v10 = vpop.eup %2391 }
 0x4ef   : > { %v1434_v11 = vmul.f32 %v2392_v10, %v2388_v47 }
 0x4f0   : > { %2285 = vmatpush3.bf16.msra.mxu0 %v2370_v31 }
 0x4f1   : > { %v1436_v12 = vpack.c.bf16 %v1434_v11, %v1434_v11  ;;  %2298 = vmatprep.subr.bf16.mxu0 %v2437_v14  ;;  %v2191_v11 = vld [vmem:[%s2926_s26] ss:$0 sm:$0xff] }
 0x4f3   : > { %2279 = vmatmul.mubr.msk.bf16.vlgmr.msra.gmra.mrb[16].mxu1 %vm1412_vm6, %v1436_v12 }
 0x4f4   : > { %2294 = vmatprep.mubr.msk.bf16.mxu1 %vm2438_vm2, %v2437_v14  ;;  %2291 = vmatpush3.bf16.msra.mxu1 %v2371_v5 }
 0x4f5   : > { %2292 = vmatprep.subr.bf16.mxu1 %v2437_v14 }
 0x4f8   : > { %2293 = vmatpush3.bf16.msra.mxu1 %v2372_v6 }
 0x5be   : > { %v1480_v15 = vpop.f32.mrb[0].mxu0 }
 0x5bf   : > { %v2274_v16 = vpop.f32.mrb[1].mxu0  ;;  %v1532_v19 = vcombine.high %v1480_v15, %v2437_v14  ;;  %v1539_v53 = vrot.slane %v1480_v15, %v2689_v56 }
 0x5c0   : > { %v1483_v17 = vpop.f32.mrb[2].mxu0 }
 0x5c1   : > { %v2275_v18 = vpop.f32.mrb[3].mxu0  ;;  %v1546_v24 = vrot.slane %v1532_v19, %v2689_v56  ;;  %v2375_v19 = vld [vmem:[%s2624_s9 + $0x10] sm:$0xff]  }
 0x5c2   : > { %v2374_v18 = vld [vmem:[%s2624_s9 + $0x8] sm:$0xff]  }
 0x5c6   : > { %v1526_v51 = vpop.f32.mrb[16].mxu1 }
 0x5c7   : > { %v1547_v20 = vcombine.high %v1526_v51, %v2437_v14  ;;  %v1554_v21 = vrot.slane %v1526_v51, %v2689_v56  ;;  %v2280_v22 = vpop.f32.mrb[17].mxu1  ;;  %v2376_v51 = vld [vmem:[%s2624_s9 + $0x18] sm:$0xff]  }
 0x5c8   : > { %v1529_v23 = vpop.f32.mrb[18].mxu1  ;;  %v2380_v22 = vld [vmem:[%s2624_s9 + $0x38] sm:$0xff]  }
 0x5c9   : > { %v1561_v25 = vrot.slane %v1547_v20, %v2689_v56  ;;  %v1562_v26 = vcombine.low %v1539_v53, %v1554_v21  ;;  %v1563_v27 = vcombine.high %v1539_v53, %v1554_v21  ;;  %v2281_v28 = vpop.f32.mrb[19].mxu1  ;;  %v2377_v53 = vld [vmem:[%s2624_s9 + $0x20] sm:$0xff]   ;;  %v2378_v20 = vld [vmem:[%s2624_s9 + $0x28] sm:$0xff]   ;;  %v2379_v21 = vld [vmem:[%s2624_s9 + $0x30] sm:$0xff]  }
 0x5ca   : > { %v2193_v23 = vld [vmem:[%s715_s23] ss:$0 sm:$0xff] }
 0x5cb   : > { %v1570_v59 = vrot.slane %v1562_v26, %v2698_v61  ;;  %v1577_v29 = vrot.slane %v1563_v27, %v2698_v61  ;;  %v1578_v38 = vcombine.low %v1546_v24, %v1561_v25  ;;  %v1579_v30 = vcombine.high %v1546_v24, %v1561_v25 }
 0x5cd   : > { %v1586_v32 = vrot.slane %v1578_v38, %v2698_v61  ;;  %v1593_v33 = vrot.slane %v1579_v30, %v2698_v61  ;;  %v1598_v34 = vcombine.low %v1570_v59, %v1577_v29  ;;  %v2185_v35 = vcombine.high %v1570_v59, %v1577_v29 }
 0x5cf   : > { %v1605_v36 = vrot.slane %v1598_v34, %v2689_v56  ;;  %v1613_v37 = vrot.slane %v2185_v35, %v2689_v56  ;;  %v1614_v39 = vcombine.low %v1586_v32, %v1593_v33  ;;  %v2186_v40 = vcombine.high %v1586_v32, %v1593_v33 }
 0x5d1   : > { %v1621_v41 = vrot.slane %v1614_v39, %v2689_v56  ;;  %v1629_v42 = vrot.slane %v2186_v40, %v2689_v56  ;;  %v1630_v43 = vcombine.low %v1605_v36, %v1613_v37  ;;  %v2187_v56 = vld [vmem:[%s2924_s3] ss:$0 sm:$0xff] }
 0x5d2   : > { %v2197_v36 = vld [vmem:[%s723_s8] ss:$0 sm:$0xff] }
 0x5d3   : > { %v1638_v44 = vcombine.low %v1621_v41, %v1629_v42  ;;  %v1637_v45 = vrot.slane %v1630_v43, %v2698_v61 }
 0x5d5   : > { %v1645_v46 = vrot.slane %v1638_v44, %v2698_v61 }
 0x5d7   : > { %v1647_v47 = vcombine.high %v1637_v45, %v1645_v46  ;;  %v1646_v48 = vcombine.low %v1637_v45, %v1645_v46 }
 0x5d9   : > { %1649 = vrot.lane.b32.xlu0 %v1647_v47, %s2443_s17 }
 0x64b   : > { %v1650_v49 = vpop.permute.xlu0 %1649 }
 0x64c   : > { %v1652_v50 = vsel %vm1308_vm4, %v1646_v48, %v1650_v49 }
 0x64d   : > { %v1653_v52 = vpack.c.bf16 %v1652_v50, %v1652_v50 }
 0x64f   : > { %2287 = vmatmul.mubr.msk.bf16.vlgmr.msra.gmra.mrb[4].mxu0 %vm739_vm1, %v1653_v52 }
 0x650   : > { %2314 = vmatprep.mubr.msk.bf16.mxu0 %vm2438_vm2, %v2437_v14 }
 0x722   : > { %v1714_v61 = vpop.f32.mrb[4].mxu0 }
 0x723   : > { %v1715_v54 = vadd.f32 %v2187_v56, %v1714_v61  ;;  %v2288_v55 = vpop.f32.mrb[5].mxu0 }
 0x724   : > { %v1717_v57 = vpop.f32.mrb[6].mxu0 }
 0x725   : > { %v2808_v58 = vadd.f32 %v1715_v54, %v2634_v1  ;;  %v2289_v60 = vpop.f32.mrb[7].mxu0  ;;  %v2373_v1 = vld [vmem:[%s2624_s9] sm:$0xff]  }
 0x726   : > { %2299 = vmatpush3.bf16.msra.mxu0 %v2373_v1 }
 0x727   : > { %v1723_v62 = vsel %vm739_vm1, %v2808_v58, 0.0  ;;  %2300 = vmatprep.subr.bf16.mxu0 %v2437_v14 }
 0x728   : > { %1724 = vadd.xlane.f32.xlu1 %v1723_v62 }
 0x72a   : > { %2301 = vmatpush3.bf16.msra.mxu0 %v2374_v18 }
 0x72b   : > { %2302 = vmatprep.subr.bf16.mxu0 %v2437_v14 }
 0x72e   : > { %2303 = vmatpush3.bf16.msra.mxu0 %v2375_v19 }
 0x72f   : > { %2304 = vmatprep.subr.bf16.mxu0 %v2437_v14 }
 0x732   : > { %2305 = vmatpush3.bf16.msra.mxu0 %v2376_v51 }
 0x733   : > { %2306 = vmatprep.subr.bf16.mxu0 %v2437_v14 }
 0x736   : > { %2307 = vmatpush3.bf16.msra.mxu0 %v2377_v53 }
 0x737   : > { %2308 = vmatprep.subr.bf16.mxu0 %v2437_v14 }
 0x73a   : > { %2309 = vmatpush3.bf16.msra.mxu0 %v2378_v20 }
 0x73b   : > { %2310 = vmatprep.subr.bf16.mxu0 %v2437_v14 }
 0x73e   : > { %2311 = vmatpush3.bf16.msra.mxu0 %v2379_v21 }
 0x73f   : > { %2312 = vmatprep.subr.bf16.mxu0 %v2437_v14 }
 0x742   : > { %2313 = vmatpush3.bf16.msra.mxu0 %v2380_v22 }
 0x7b5   : > { %v1725_v63 = vpop.xlane.xlu1 %1724 }
 0x7b6   : > { %v1726_v0 = vmul.f32 0.03125, %v1725_v63 }
 0x7b8   : > { %v1727_v2 = vsub.f32 %v2808_v58, %v1726_v0 }
 0x7ba   : > { %v1728_v3 = vmul.f32 %v1727_v2, %v1727_v2 }
 0x7bc   : > { %v1729_v4 = vsel %vm739_vm1, %v1728_v3, 0.0 }
 0x7bd   : > { %1730 = vadd.xlane.f32.xlu1 %v1729_v4 }
 0x84a   : > { %v1731_v7 = vpop.xlane.xlu1 %1730 }
 0x84b   : > { %v1732_v8 = vmul.f32 0.03125, %v1731_v7 }
 0x84d   : > { %v1733_v9 = vadd.f32 1e-05, %v1732_v8 }
 0x84f   : > { %2393 = vrsqrt.f32 %v1733_v9 }
 0x859   : > { %v2394_v10 = vpop.eup %2393 }
 0x85a   : > { %v1735_v12 = vmul.f32 %v2394_v10, %v1727_v2 }
 0x85c   : > { %v1742_v15 = vmul.f32 %v2191_v11, %v1735_v12 }
 0x85e   : > { %v1749_v16 = vadd.f32 %v2192_v13, %v1742_v15 }
 0x860   : > { %v1750_v17 = vpack.c.bf16 %v1749_v16, %v1749_v16 }
 0x862   : > { %2295 = vmatmul.mubr.msk.bf16.vlgmr.msra.gmra.mrb[20].mxu1 %vm739_vm1, %v1750_v17 }
 0x935   : > { %v1811_v24 = vpop.f32.mrb[20].mxu1 }
 0x936   : > { %v1812_v25 = vadd.f32 %v2193_v23, %v1811_v24  ;;  %v2296_v26 = vpop.f32.mrb[21].mxu1 }
 0x937   : > { %v1814_v27 = vpop.f32.mrb[22].mxu1 }
 0x938   : > { %v1818_v28 = vmul.f32 0.044715, %v1812_v25  ;;  %v2297_v59 = vpop.f32.mrb[23].mxu1  ;;  %v1817_v32 = vmul.f32 0.5, %v1812_v25 }
 0x93a   : > { %v1819_v29 = vmul.f32 %v1818_v28, %v1812_v25 }
 0x93c   : > { %v1820_v38 = vmul.f32 %v1819_v29, %v1812_v25 }
 0x93e   : > { %v1821_v30 = vadd.f32 %v1820_v38, %v1812_v25 }
 0x940   : > { %v1822_v31 = vmul.f32 0.7978846, %v1821_v30 }
 0x942   : > { %2395 = vtanh.f32 %v1822_v31 }
 0x94c   : > { %v2396_v14 = vpop.eup %2395 }
 0x94d   : > { %v1824_v33 = vadd.f32 1.0, %v2396_v14 }
 0x94f   : > { %v1825_v34 = vmul.f32 %v1824_v33, %v1817_v32 }
 0x951   : > { %v1826_v35 = vpack.c.bf16 %v1825_v34, %v1825_v34 }
 0x953   : > { %2315 = vmatmul.mubr.bf16.vlgmr.msra.gmra.mrb[8].mxu0 %v1826_v35 }
 0xa26   : > { %v1932_v37 = vpop.f32.mrb[8].mxu0 }
 0xa27   : > { %v1933_v39 = vadd.f32 %v2197_v36, %v1932_v37  ;;  %v2316_v40 = vpop.f32.mrb[9].mxu0 }
 0xa28   : > { %v1935_v41 = vpop.f32.mrb[10].mxu0 }
 0xa29   : > { %v1938_v42 = vadd.f32 %v1933_v39, %v2808_v58  ;;  %v2317_v43 = vpop.f32.mrb[11].mxu0 }
 0xa2b   : > { %1939 = vst.msk [vmem:[%s2629_s4] sm:$0xff] %vm739_vm1, %v1938_v42 }
 0xa2c PF: > { %s2929_s24 = sld [smem:[#allocation7_spill]]  ;;  %s2930_s18 = sld [smem:[#allocation5_spill]] }
 0xa2d   : > { %s2931_s19 = sld [smem:[#allocation6_spill]]  ;;  %s2932_s20 = sld [smem:[#allocation8_spill]] }
 0xa2e   : > { %s2933_s21 = sld [smem:[#allocation9_spill]] }
 0xa32   : > { %s25_s22 = sadd.s32 1, %s2929_s24  }
 0xa33   : > { %p22_p8 = scmp.ge.s32.totalorder %s25_s22, 6  }
 0xa35   :  { %24 = sbr.rel (!%p22_p8) target bundleno = 11 (0xb), region = 156 }

</bundles_post_ra>
